<compile_context>
chip_gen: v7x
topology: tpu7x:2x2x1
jax: 0.10.0
libtpu: 0.0.40
codegen_flags: <defaults>
</compile_context>

<pallas_src>
import jax
import jax.numpy as jnp
from jax.experimental import pallas as pl
from jax.experimental.pallas import tpu as pltpu

VOCAB = 32            # vocab_size (small, synthetic)
EMBED = 10            # embed_dim  (from the module)
CTX = 2               # context_size (from the module)
HIDDEN = 128          # linear1 output features (from the module)
PAD_VOCAB = 128       # vocab / folded-table rows padded to a full lane width
MAX_B_TILE = 2048     # upper bound on the batch tile (VMEM: ~1 MB out tile)


def _round_up(x, m):
    return (x + m - 1) // m * m


def _choose_tile(b):
    """Largest tile in [128, 2048] that keeps the grid >= 2 steps when possible."""
    for t in (2048, 1024, 512, 256):
        if b >= 2 * t:
            return t
    return min(MAX_B_TILE, _round_up(max(b, 1), 128))


def ngram_kernel(idx_ref, wf_ref, b1_ref, w2_ref, b2_ref, out_ref):
    # idx_ref : VMEM (B_TILE, CTX) int32          -- token indices for this tile
    # wf_ref  : VMEM (PAD_VOCAB, HIDDEN) f32      -- folded emb@W1 table (rows >= CTX*VOCAB are zero)
    # b1_ref  : VMEM (1, HIDDEN) f32
    # w2_ref  : VMEM (HIDDEN, PAD_VOCAB) f32      -- linear2 weight, zero-padded lanes
    # b2_ref  : VMEM (1, PAD_VOCAB) f32
    # out_ref : VMEM (B_TILE, PAD_VOCAB) f32      -- log-probabilities (padded lanes = -inf)
    bt = idx_ref.shape[0]
    ids = idx_ref[...]                                            # (B_TILE, CTX)

    # One shared iota: reused for the combined one-hot AND the padded-lane mask.
    col = jax.lax.broadcasted_iota(jnp.int32, (bt, PAD_VOCAB), 1)  # (B_TILE, 128)

    # Combined one-hot: column c*VOCAB + ids[:, c] is hot for each context
    # position c.  onehot @ Wf == sum_c emb[ids[:,c]] @ W1[c] == linear1 input product.
    hit = col == ids[:, 0:1]
    for c in range(1, CTX):                                       # static unrolled (CTX=2)
        hit = hit | (col == (c * VOCAB + ids[:, c:c + 1]))
    onehot = hit.astype(jnp.float32)                              # (B_TILE, 128)

    # linear1 (via folded table) + bias + ReLU: one full-K 128-wide MXU matmul.
    h = jnp.dot(onehot, wf_ref[...],
                preferred_element_type=jnp.float32) + b1_ref[...]
    h = jnp.maximum(h, 0.0)                                       # (B_TILE, HIDDEN)

    # linear2 + ReLU (per the module spec), lane-padded to 128.
    o = jnp.dot(h, w2_ref[...],
                preferred_element_type=jnp.float32) + b2_ref[...]
    o = jnp.maximum(o, 0.0)                                       # (B_TILE, PAD_VOCAB)

    # log_softmax over the real VOCAB lanes; padded lanes masked to -inf.
    logits = jnp.where(col < VOCAB, o, -jnp.inf)
    m = jnp.max(logits, axis=-1, keepdims=True)
    lse = m + jnp.log(jnp.sum(jnp.exp(logits - m), axis=-1, keepdims=True))
    out_ref[...] = logits - lse


def prepare_params(emb_table, w1, b1, w2, b2):
    """One-time parameter massaging (fold emb into W1, pad to lane width)."""
    w1r = w1.reshape(CTX, EMBED, HIDDEN)
    # folded[c*VOCAB + v, :] = emb[v] @ w1r[c]   -> (CTX*VOCAB, HIDDEN)
    folded = jnp.einsum("ve,ceh->cvh", emb_table.astype(jnp.float32),
                        w1r.astype(jnp.float32)).reshape(CTX * VOCAB, HIDDEN)
    wf = jnp.zeros((PAD_VOCAB, HIDDEN), jnp.float32).at[:CTX * VOCAB, :].set(folded)
    w2p = jnp.zeros((HIDDEN, PAD_VOCAB), jnp.float32).at[:, :VOCAB].set(w2)
    b2p = jnp.zeros((1, PAD_VOCAB), jnp.float32).at[:, :VOCAB].set(b2)
    b1r = b1.reshape(1, HIDDEN).astype(jnp.float32)
    return wf, b1r, w2p, b2p


def ngram_forward(indices, params):
    """Batched forward: indices is (B, CTX) int; returns (B, VOCAB) log-probs."""
    wf, b1r, w2p, b2p = params
    indices = indices.astype(jnp.int32)
    B = indices.shape[0]
    b_tile = _choose_tile(B)
    b_pad = pl.cdiv(B, b_tile) * b_tile

    # Pad batch to a multiple of the tile (extra rows use token 0; sliced off).
    idx = jnp.zeros((b_pad, CTX), dtype=jnp.int32).at[:B, :].set(indices)

    out = pl.pallas_call(
        ngram_kernel,
        out_shape=jax.ShapeDtypeStruct((b_pad, PAD_VOCAB), jnp.float32),
        grid_spec=pltpu.PrefetchScalarGridSpec(
            num_scalar_prefetch=0,
            grid=(b_pad // b_tile,),
            in_specs=[
                pl.BlockSpec((b_tile, CTX), lambda i: (i, 0)),           # indices tile
                pl.BlockSpec((PAD_VOCAB, HIDDEN), lambda i: (0, 0)),     # folded emb@W1 (resident)
                pl.BlockSpec((1, HIDDEN), lambda i: (0, 0)),             # b1
                pl.BlockSpec((HIDDEN, PAD_VOCAB), lambda i: (0, 0)),     # w2 (padded)
                pl.BlockSpec((1, PAD_VOCAB), lambda i: (0, 0)),          # b2 (padded)
            ],
            out_specs=pl.BlockSpec((b_tile, PAD_VOCAB), lambda i: (i, 0)),
        ),
        compiler_params=pltpu.CompilerParams(
            dimension_semantics=("parallel",)),
    )(idx, wf, b1r, w2p, b2p)

    return out[:B, :VOCAB]


ngram_forward_jit = jax.jit(ngram_forward)


def reference_forward(indices, emb_table, w1, b1, w2, b2):
    """Pure-JAX reference of the (per-example) PyTorch forward, vectorized over batch."""
    embeds = emb_table[indices].reshape(indices.shape[0], -1)   # (B, CTX*EMBED)
    h = jnp.maximum(embeds @ w1 + b1, 0.0)
    o = jnp.maximum(h @ w2 + b2, 0.0)
    return jax.nn.log_softmax(o, axis=-1)


if __name__ == "__main__":
    key = jax.random.PRNGKey(0)
    k_emb, k_w1, k_b1, k_w2, k_b2, k_idx = jax.random.split(key, 6)

    # Deterministic synthetic parameters (shapes per the module __init__).
    emb_table = jax.random.normal(k_emb, (VOCAB, EMBED), dtype=jnp.float32) * 0.1
    w1 = jax.random.normal(k_w1, (CTX * EMBED, HIDDEN), dtype=jnp.float32) * 0.1
    b1 = jax.random.normal(k_b1, (1, HIDDEN), dtype=jnp.float32) * 0.1
    w2 = jax.random.normal(k_w2, (HIDDEN, VOCAB), dtype=jnp.float32) * 0.1
    b2 = jax.random.normal(k_b2, (1, VOCAB), dtype=jnp.float32) * 0.1

    # One-time parameter preprocessing (fold + padding), hoisted out of the call.
    params = prepare_params(emb_table, w1, b1, w2, b2)

    # Batch of contexts (each row is one call to the PyTorch module).
    B = 256
    indices = jax.random.randint(k_idx, (B, CTX), 0, VOCAB, dtype=jnp.int32)

    log_probs = ngram_forward_jit(indices, params)
    log_probs = jax.block_until_ready(log_probs)

    ref = reference_forward(indices, emb_table, w1, b1, w2, b2)
    assert log_probs.shape == (B, VOCAB)
    assert jnp.allclose(log_probs, ref, atol=1e-5, rtol=1e-5), (
        "Pallas kernel output diverged from JAX reference"
    )

    print("KERNEL_OK")
</pallas_src>

<mosaic_0001>
module attributes {stable_mosaic.version = 11 : i64} {
  func.func @ngram_kernel(%arg0: i32, %arg1: memref<256x2xi32, #tpu.memory_space<vmem>>, %arg2: memref<128x128xf32, #tpu.memory_space<vmem>>, %arg3: memref<1x128xf32, #tpu.memory_space<vmem>>, %arg4: memref<128x128xf32, #tpu.memory_space<vmem>>, %arg5: memref<1x128xf32, #tpu.memory_space<vmem>>, %arg6: memref<256x128xf32, #tpu.memory_space<vmem>>) attributes {dimension_semantics = [#tpu.dimension_semantics<parallel>], iteration_bounds = array<i64: 1>, scalar_prefetch = 0 : i64, scratch_operands = 0 : i64, tpu.core_type = #tpu.core_type<tc>, window_params = [{transform_indices = @transform_0, window_bounds = array<i64: 256, 2>}, {pipeline_mode = #tpu.pipeline_mode<synchronous>, transform_indices = @transform_1, window_bounds = array<i64: 128, 128>}, {pipeline_mode = #tpu.pipeline_mode<synchronous>, transform_indices = @transform_2, window_bounds = array<i64: 1, 128>}, {pipeline_mode = #tpu.pipeline_mode<synchronous>, transform_indices = @transform_3, window_bounds = array<i64: 128, 128>}, {pipeline_mode = #tpu.pipeline_mode<synchronous>, transform_indices = @transform_4, window_bounds = array<i64: 1, 128>}, {transform_indices = @transform_5, window_bounds = array<i64: 256, 128>}]} {
    %c0 = arith.constant 0 : index
    %c0_0 = arith.constant 0 : index
    %0 = vector.load %arg1[%c0, %c0_0] : memref<256x2xi32, #tpu.memory_space<vmem>>, vector<256x2xi32>
    %1 = tpu.iota {dimensions = array<i32: 1>} : vector<256x128xi32>
    %2 = vector.extract_strided_slice %0 {offsets = [0, 0], sizes = [256, 1], strides = [1, 1]} : vector<256x2xi32> to vector<256x1xi32>
    %3 = vector.broadcast %2 : vector<256x1xi32> to vector<256x128xi32>
    %4 = arith.cmpi eq, %1, %3 : vector<256x128xi32>
    %5 = vector.extract_strided_slice %0 {offsets = [0, 1], sizes = [256, 1], strides = [1, 1]} : vector<256x2xi32> to vector<256x1xi32>
    %c32_i32 = arith.constant 32 : i32
    %6 = vector.broadcast %c32_i32 : i32 to vector<256x1xi32>
    %7 = arith.addi %6, %5 : vector<256x1xi32>
    %8 = vector.broadcast %7 : vector<256x1xi32> to vector<256x128xi32>
    %9 = arith.cmpi eq, %1, %8 : vector<256x128xi32>
    %10 = arith.ori %4, %9 : vector<256x128xi1>
    %11 = arith.extui %10 : vector<256x128xi1> to vector<256x128xi32>
    %12 = arith.sitofp %11 : vector<256x128xi32> to vector<256x128xf32>
    %c0_1 = arith.constant 0 : index
    %c0_2 = arith.constant 0 : index
    %13 = vector.load %arg2[%c0_1, %c0_2] : memref<128x128xf32, #tpu.memory_space<vmem>>, vector<128x128xf32>
    %cst = arith.constant dense<0.000000e+00> : vector<256x128xf32>
    %14 = tpu.matmul %12, %13, %cst {dimension_numbers = #tpu.dot_dimension_numbers<[1], [0], [0], [1], [0, 0, 1, 1], [], []>} : vector<256x128xf32>, vector<128x128xf32>, vector<256x128xf32> -> vector<256x128xf32>
    %c0_3 = arith.constant 0 : index
    %c0_4 = arith.constant 0 : index
    %15 = vector.load %arg3[%c0_3, %c0_4] : memref<1x128xf32, #tpu.memory_space<vmem>>, vector<1x128xf32>
    %16 = vector.broadcast %15 : vector<1x128xf32> to vector<256x128xf32>
    %17 = arith.addf %14, %16 : vector<256x128xf32>
    %cst_5 = arith.constant 0.000000e+00 : f32
    %18 = vector.broadcast %cst_5 : f32 to vector<256x128xf32>
    %19 = arith.maximumf %17, %18 : vector<256x128xf32>
    %c0_6 = arith.constant 0 : index
    %c0_7 = arith.constant 0 : index
    %20 = vector.load %arg4[%c0_6, %c0_7] : memref<128x128xf32, #tpu.memory_space<vmem>>, vector<128x128xf32>
    %cst_8 = arith.constant dense<0.000000e+00> : vector<256x128xf32>
    %21 = tpu.matmul %19, %20, %cst_8 {dimension_numbers = #tpu.dot_dimension_numbers<[1], [0], [0], [1], [0, 0, 1, 1], [], []>} : vector<256x128xf32>, vector<128x128xf32>, vector<256x128xf32> -> vector<256x128xf32>
    %c0_9 = arith.constant 0 : index
    %c0_10 = arith.constant 0 : index
    %22 = vector.load %arg5[%c0_9, %c0_10] : memref<1x128xf32, #tpu.memory_space<vmem>>, vector<1x128xf32>
    %23 = vector.broadcast %22 : vector<1x128xf32> to vector<256x128xf32>
    %24 = arith.addf %21, %23 : vector<256x128xf32>
    %cst_11 = arith.constant 0.000000e+00 : f32
    %25 = vector.broadcast %cst_11 : f32 to vector<256x128xf32>
    %26 = arith.maximumf %24, %25 : vector<256x128xf32>
    %c32_i32_12 = arith.constant 32 : i32
    %27 = vector.broadcast %c32_i32_12 : i32 to vector<256x128xi32>
    %28 = arith.cmpi slt, %1, %27 : vector<256x128xi32>
    %cst_13 = arith.constant 0xFF800000 : f32
    %29 = vector.broadcast %cst_13 : f32 to vector<256x128xf32>
    %30 = arith.select %28, %26, %29 : vector<256x128xi1>, vector<256x128xf32>
    %cst_14 = arith.constant dense<0xFF800000> : vector<256xf32>
    %31 = vector.multi_reduction <maximumf>, %30, %cst_14 [1] : vector<256x128xf32> to vector<256xf32>
    %32 = vector.shape_cast %31 : vector<256xf32> to vector<256x1xf32>
    %33 = vector.broadcast %32 : vector<256x1xf32> to vector<256x128xf32>
    %34 = arith.subf %30, %33 : vector<256x128xf32>
    %35 = math.exp %34 : vector<256x128xf32>
    %cst_15 = arith.constant dense<0.000000e+00> : vector<256xf32>
    %36 = vector.multi_reduction <add>, %35, %cst_15 [1] : vector<256x128xf32> to vector<256xf32>
    %37 = vector.shape_cast %36 : vector<256xf32> to vector<256x1xf32>
    %38 = math.log %37 : vector<256x1xf32>
    %39 = arith.addf %32, %38 : vector<256x1xf32>
    %40 = vector.broadcast %39 : vector<256x1xf32> to vector<256x128xf32>
    %41 = arith.subf %30, %40 : vector<256x128xf32>
    %c0_16 = arith.constant 0 : index
    %c0_17 = arith.constant 0 : index
    %42 = vector.load %arg6[%c0_16, %c0_17] : memref<256x128xf32, #tpu.memory_space<vmem>>, vector<256x128xf32>
    tpu.vector_store %arg6[%c0_16, %c0_17], %41 {strides = array<i32>} : memref<256x128xf32, #tpu.memory_space<vmem>>, vector<256x128xf32>,
    return
  }
  func.func @transform_0(%arg0: i32) -> (i32, i32) {
    %c0_i32 = arith.constant 0 : i32
    %c0_i32_0 = arith.constant 0 : i32
    return %arg0, %c0_i32 : i32, i32
  }
  func.func @transform_1(%arg0: i32) -> (i32, i32) {
    %c0_i32 = arith.constant 0 : i32
    %c0_i32_0 = arith.constant 0 : i32
    %c0_i32_1 = arith.constant 0 : i32
    return %c0_i32, %c0_i32_0 : i32, i32
  }
  func.func @transform_2(%arg0: i32) -> (i32, i32) {
    %c0_i32 = arith.constant 0 : i32
    %c0_i32_0 = arith.constant 0 : i32
    %c0_i32_1 = arith.constant 0 : i32
    return %c0_i32, %c0_i32_0 : i32, i32
  }
  func.func @transform_3(%arg0: i32) -> (i32, i32) {
    %c0_i32 = arith.constant 0 : i32
    %c0_i32_0 = arith.constant 0 : i32
    %c0_i32_1 = arith.constant 0 : i32
    return %c0_i32, %c0_i32_0 : i32, i32
  }
  func.func @transform_4(%arg0: i32) -> (i32, i32) {
    %c0_i32 = arith.constant 0 : i32
    %c0_i32_0 = arith.constant 0 : i32
    %c0_i32_1 = arith.constant 0 : i32
    return %c0_i32, %c0_i32_0 : i32, i32
  }
  func.func @transform_5(%arg0: i32) -> (i32, i32) {
    %c0_i32 = arith.constant 0 : i32
    %c0_i32_0 = arith.constant 0 : i32
    return %arg0, %c0_i32 : i32, i32
  }
}

</mosaic_0001>

<bundles_post_ra>
// kernel: ngram_forward.1
= control target key start
LH: loop header
LB: loop body
LE: loop exit
PB: predicated region body
PF: predicated region fallthrough
CT: control target
= control target key end

     0   :  { %v1941_v0 = vmov 0   ;;  %v1942_v6 = vmov 1   ;;  %s2787_s0 = inlined_call_operand.vmem [shape: s32[256,2], index: 0, kind: input, shape index: {}]   ;;  %s2788_s1 = inlined_call_operand.vmem [shape: f32[128,128], index: 1, kind: input, shape index: {}]   ;;  %s2789_s3 = inlined_call_operand.vmem [shape: f32[128,128], index: 3, kind: input, shape index: {}]   ;;  %s2790_s2 = inlined_call_operand.vmem [shape: f32[1,128], index: 2, kind: input, shape index: {}]   ;;  %s2791_s4 = inlined_call_operand.vmem [shape: f32[1,128], index: 4, kind: input, shape index: {}]   ;;  %s2792_s5 = inlined_call_operand.vmem [shape: f32[256,128], index: 5, kind: output, shape index: {}]  }
   0x1   :  { %1810 = vset.pattern.permute.xlu1 %v1941_v0  ;;  %1808 = vset.pattern.permute.xlu0 %v1941_v0  ;;  %v21_v1 = vld [vmem:[%s2787_s0 + $0x8] sm:$0xff]  ;;  %v20_v2 = vld [vmem:[%s2787_s0] sm:$0xff]  ;;  %v22_v5 = vld [vmem:[%s2787_s0 + $0x10] sm:$0xff] }
   0x2   :  { %58 = vperm.xlu1 %1810, %v21_v1   ;;  %55 = vperm.xlu0 %1808, %v20_v2   ;;  %v183_v3 = vadd.s32 32, %v21_v1  ;;  %v182_v4 = vadd.s32 32, %v20_v2  ;;  %v184_v7 = vadd.s32 32, %v22_v5  ;;  %v23_v8 = vld [vmem:[%s2787_s0 + $0x18] sm:$0xff]  ;;  %v438_v9 = vld [vmem:[%s2788_s1] sm:$0xff]  ;;  %v439_v10 = vld [vmem:[%s2788_s1 + $0x8] sm:$0xff] }
   0x3   :  { %v440_v11 = vld [vmem:[%s2788_s1 + $0x10] sm:$0xff]  ;;  %v185_v12 = vadd.s32 32, %v23_v8  ;;  %v1741_v13 = vpack.c.bf16 %v439_v10, %v438_v9  ;;  %v441_v14 = vld [vmem:[%s2788_s1 + $0x18] sm:$0xff]  ;;  %v24_v15 = vld [vmem:[%s2787_s0 + $0x20] sm:$0xff] }
   0x4   :  { %v1745_v16 = vpack.c.bf16 %v441_v14, %v440_v11  ;;  %v442_v17 = vld [vmem:[%s2788_s1 + $0x20] sm:$0xff]  ;;  %v443_v18 = vld [vmem:[%s2788_s1 + $0x28] sm:$0xff]  ;;  %v186_v19 = vadd.s32 32, %v24_v15  ;;  %v444_v22 = vld [vmem:[%s2788_s1 + $0x30] sm:$0xff] }
   0x5   :  { %1742 = vmatprep.subr.bf16.mxu0 %v1741_v13  ;;  %v1749_v20 = vpack.c.bf16 %v443_v18, %v442_v17  ;;  %v25_v21 = vld [vmem:[%s2787_s0 + $0x28] sm:$0xff]  ;;  %v445_v23 = vld [vmem:[%s2788_s1 + $0x38] sm:$0xff]  ;;  %v26_v26 = vld [vmem:[%s2787_s0 + $0x30] sm:$0xff] }
   0x6   :  { %1811 = vset.pattern.permute.xlu1 %v1942_v6  ;;  %1809 = vset.pattern.permute.xlu0 %v1942_v6  ;;  %v187_v24 = vadd.s32 32, %v25_v21  ;;  %v1753_v25 = vpack.c.bf16 %v445_v23, %v444_v22  ;;  %v446_v27 = vld [vmem:[%s2788_s1 + $0x40] sm:$0xff]  ;;  %v447_v28 = vld [vmem:[%s2788_s1 + $0x48] sm:$0xff]  ;;  %v188_v29 = vadd.s32 32, %v26_v26  ;;  %v27_v31 = vld [vmem:[%s2787_s0 + $0x38] sm:$0xff] }
   0x7   :  { %218 = vperm.xlu1 %1811, %v183_v3   ;;  %215 = vperm.xlu0 %1809, %v182_v4   ;;  %v1757_v30 = vpack.c.bf16 %v447_v28, %v446_v27  ;;  %v448_v32 = vld [vmem:[%s2788_s1 + $0x50] sm:$0xff]  ;;  %v449_v33 = vld [vmem:[%s2788_s1 + $0x58] sm:$0xff]  ;;  %v189_v34 = vadd.s32 32, %v27_v31  ;;  %v28_v36 = vld [vmem:[%s2787_s0 + $0x40] sm:$0xff] }
   0x8   :  { %1744 = vmatpush3.bf16.msra.mxu0 %v1741_v13  ;;  %v1761_v35 = vpack.c.bf16 %v449_v33, %v448_v32  ;;  %v450_v37 = vld [vmem:[%s2788_s1 + $0x60] sm:$0xff]  ;;  %v451_v38 = vld [vmem:[%s2788_s1 + $0x68] sm:$0xff]  ;;  %v190_v39 = vadd.s32 32, %v28_v36  ;;  %v452_v42 = vld [vmem:[%s2788_s1 + $0x70] sm:$0xff] }
   0x9   :  { %1746 = vmatprep.subr.bf16.mxu0 %v1745_v16  ;;  %v1765_v40 = vpack.c.bf16 %v451_v38, %v450_v37  ;;  %v29_v41 = vld [vmem:[%s2787_s0 + $0x48] sm:$0xff]  ;;  %v453_v43 = vld [vmem:[%s2788_s1 + $0x78] sm:$0xff]  ;;  %v30_v46 = vld [vmem:[%s2787_s0 + $0x50] sm:$0xff] }
   0xa   :  { %v191_v44 = vadd.s32 32, %v29_v41  ;;  %v1769_v45 = vpack.c.bf16 %v453_v43, %v452_v42  ;;  %v192_v47 = vadd.s32 32, %v30_v46  ;;  %v31_v48 = vld [vmem:[%s2787_s0 + $0x58] sm:$0xff]  ;;  %v32_v50 = vld [vmem:[%s2787_s0 + $0x60] sm:$0xff]  ;;  %v33_v52 = vld [vmem:[%s2787_s0 + $0x68] sm:$0xff]  ;;  %v1943_v43 = vmov 1.0  }
   0xb   :  { %1812 = vset.pattern.permute.xlu1 %v1941_v0  ;;  %221 = vperm.xlu0 %1809, %v184_v7   ;;  %v193_v49 = vadd.s32 32, %v31_v48  ;;  %v194_v51 = vadd.s32 32, %v32_v50  ;;  %v195_v53 = vadd.s32 32, %v33_v52  ;;  %v34_v54 = vld [vmem:[%s2787_s0 + $0x70] sm:$0xff]  ;;  %v35_v56 = vld [vmem:[%s2787_s0 + $0x78] sm:$0xff]  ;;  %v36_v58 = vld [vmem:[%s2787_s0 + $0x80] sm:$0xff] }
   0xc   :  { %61 = vperm.xlu1 %1812, %v22_v5   ;;  %1748 = vmatpush3.bf16.msra.mxu0 %v1745_v16  ;;  %v196_v55 = vadd.s32 32, %v34_v54  ;;  %v197_v57 = vadd.s32 32, %v35_v56  ;;  %v198_v59 = vadd.s32 32, %v36_v58  ;;  %v37_v60 = vld [vmem:[%s2787_s0 + $0x88] sm:$0xff]  ;;  %v38_v62 = vld [vmem:[%s2787_s0 + $0x90] sm:$0xff]  ;;  %v39_v0 = vld [vmem:[%s2787_s0 + $0x98] sm:$0xff] }
   0xd   :  { %1750 = vmatprep.subr.bf16.mxu0 %v1749_v20  ;;  %v199_v61 = vadd.s32 32, %v37_v60  ;;  %v200_v63 = vadd.s32 32, %v38_v62  ;;  %v201_v1 = vadd.s32 32, %v39_v0  ;;  %v40_v2 = vld [vmem:[%s2787_s0 + $0xa0] sm:$0xff]  ;;  %v41_v4 = vld [vmem:[%s2787_s0 + $0xa8] sm:$0xff]  ;;  %v42_v6 = vld [vmem:[%s2787_s0 + $0xb0] sm:$0xff] }
   0xe   :  { %v202_v3 = vadd.s32 32, %v40_v2  ;;  %v203_v5 = vadd.s32 32, %v41_v4  ;;  %v204_v7 = vadd.s32 32, %v42_v6  ;;  %v44_v10 = vld [vmem:[%s2787_s0 + $0xc0] sm:$0xff]  ;;  %v46_v14 = vld [vmem:[%s2787_s0 + $0xd0] sm:$0xff]  ;;  %v47_v16 = vld [vmem:[%s2787_s0 + $0xd8] sm:$0xff] }
   0xf   :  { %224 = vperm.xlu0 %1809, %v185_v12   ;;  %v206_v11 = vadd.s32 32, %v44_v10  ;;  %v45_v12 = vld [vmem:[%s2787_s0 + $0xc8] sm:$0xff]  ;;  %v209_v17 = vadd.s32 32, %v47_v16  ;;  %v48_v18 = vld [vmem:[%s2787_s0 + $0xe0] sm:$0xff]  ;;  %v50_v22 = vld [vmem:[%s2787_s0 + $0xf0] sm:$0xff] }
  0x10   :  { %64 = vperm.xlu1 %1812, %v23_v8   ;;  %1752 = vmatpush3.bf16.msra.mxu0 %v1749_v20  ;;  %v43_v8 = vld [vmem:[%s2787_s0 + $0xb8] sm:$0xff]  ;;  %v207_v13 = vadd.s32 32, %v45_v12  ;;  %v49_v20 = vld [vmem:[%s2787_s0 + $0xe8] sm:$0xff]  ;;  %v212_v23 = vadd.s32 32, %v50_v22  ;;  %v720_v32 = vld [vmem:[%s2789_s3 + $0x10] sm:$0xff] }
  0x11   :  { %1754 = vmatprep.subr.bf16.mxu0 %v1753_v25  ;;  %v205_v9 = vadd.s32 32, %v43_v8  ;;  %v723_v37 = vld [vmem:[%s2789_s3 + $0x28] sm:$0xff]  ;;  %v725_v42 = vld [vmem:[%s2789_s3 + $0x38] sm:$0xff] }
  0x13   :  { %227 = vperm.xlu0 %1809, %v186_v19   ;;  %v210_v19 = vadd.s32 32, %v48_v18 }
  0x14   :  { %67 = vperm.xlu1 %1812, %v24_v15   ;;  %1756 = vmatpush3.bf16.msra.mxu0 %v1753_v25  ;;  %v208_v15 = vadd.s32 32, %v46_v14 }
  0x15   :  { %1758 = vmatprep.subr.bf16.mxu0 %v1757_v30 }
  0x17   :  { %230 = vperm.xlu0 %1809, %v187_v24   ;;  %v51_v24 = vld [vmem:[%s2787_s0 + $0xf8] sm:$0xff] }
  0x18   :  { %70 = vperm.xlu1 %1812, %v25_v21   ;;  %1760 = vmatpush3.bf16.msra.mxu0 %v1757_v30  ;;  %v211_v21 = vadd.s32 32, %v49_v20  ;;  %v213_v25 = vadd.s32 32, %v51_v24  ;;  %v718_v30 = vld [vmem:[%s2789_s3] sm:$0xff] }
  0x19   :  { %1762 = vmatprep.subr.bf16.mxu0 %v1761_v35 }
  0x1b   :  { %233 = vperm.xlu0 %1809, %v188_v29  }
  0x1c   :  { %73 = vperm.xlu1 %1812, %v26_v26   ;;  %1764 = vmatpush3.bf16.msra.mxu0 %v1761_v35  ;;  %v52_v26 = vlaneseq }
  0x1d   :  { %1766 = vmatprep.subr.bf16.mxu0 %v1765_v40 }
  0x1e   :  { %v2118_v29 = vand.u32 127, %v52_v26 }
  0x1f   :  { %236 = vperm.xlu0 %1809, %v189_v34   ;;  %v721_v34 = vld [vmem:[%s2789_s3 + $0x18] sm:$0xff] }
  0x20   :  { %76 = vperm.xlu1 %1812, %v27_v31   ;;  %1768 = vmatpush3.bf16.msra.mxu0 %v1765_v40  ;;  %v719_v31 = vld [vmem:[%s2789_s3 + $0x8] sm:$0xff]  ;;  %v1777_v35 = vpack.c.bf16 %v721_v34, %v720_v32  ;;  %v732_v34 = vld [vmem:[%s2789_s3 + $0x70] sm:$0xff] }
  0x21   :  { %1770 = vmatprep.subr.bf16.mxu0 %v1769_v45  ;;  %v1773_v33 = vpack.c.bf16 %v719_v31, %v718_v30 }
  0x23   :  { %239 = vperm.xlu0 %1809, %v190_v39   ;;  %1774 = vmatprep.subr.bf16.mxu1 %v1773_v33 }
  0x24   :  { %79 = vperm.xlu1 %1812, %v28_v36   ;;  %1772 = vmatpush3.bf16.msra.mxu0 %v1769_v45  ;;  %v722_v36 = vld [vmem:[%s2789_s3 + $0x20] sm:$0xff] }
  0x25   :  { %1776 = vmatpush3.bf16.msra.mxu1 %v1773_v33  ;;  %v1781_v40 = vpack.c.bf16 %v723_v37, %v722_v36 }
  0x26   :  { %1778 = vmatprep.subr.bf16.mxu1 %v1777_v35 }
  0x27   :  { %242 = vperm.xlu0 %1809, %v191_v44  }
  0x28   :  { %82 = vperm.xlu1 %1812, %v29_v41   ;;  %v724_v41 = vld [vmem:[%s2789_s3 + $0x30] sm:$0xff] }
  0x29   :  { %1780 = vmatpush3.bf16.msra.mxu1 %v1777_v35  ;;  %v733_v35 = vld [vmem:[%s2789_s3 + $0x78] sm:$0xff] }
  0x2a   :  { %1782 = vmatprep.subr.bf16.mxu1 %v1781_v40  ;;  %v1801_v37 = vpack.c.bf16 %v733_v35, %v732_v34 }
  0x2b   :  { %245 = vperm.xlu0 %1809, %v192_v47   ;;  %v726_v47 = vld [vmem:[%s2789_s3 + $0x40] sm:$0xff] }
  0x2c   :  { %85 = vperm.xlu1 %1812, %v30_v46   ;;  %v1785_v46 = vpack.c.bf16 %v725_v42, %v724_v41 }
  0x2d   :  { %1784 = vmatpush3.bf16.msra.mxu1 %v1781_v40 }
  0x2e   :  { %1786 = vmatprep.subr.bf16.mxu1 %v1785_v46 }
  0x2f   :  { %248 = vperm.xlu0 %1809, %v193_v49  }
  0x30   :  { %88 = vperm.xlu1 %1812, %v31_v48   ;;  %v727_v48 = vld [vmem:[%s2789_s3 + $0x48] sm:$0xff] }
  0x31   :  { %1788 = vmatpush3.bf16.msra.mxu1 %v1785_v46 }
  0x33   :  { %251 = vperm.xlu0 %1809, %v194_v51   ;;  %v1789_v51 = vpack.c.bf16 %v727_v48, %v726_v47 }
  0x34   :  { %91 = vperm.xlu1 %1812, %v32_v50  }
  0x35   :  { %1790 = vmatprep.subr.bf16.mxu1 %v1789_v51 }
  0x36   :  { %1792 = vmatpush3.bf16.msra.mxu1 %v1789_v51 }
  0x37   :  { %254 = vperm.xlu0 %1809, %v195_v53   ;;  %v729_v53 = vld [vmem:[%s2789_s3 + $0x58] sm:$0xff] }
  0x38   :  { %94 = vperm.xlu1 %1812, %v33_v52   ;;  %v728_v52 = vld [vmem:[%s2789_s3 + $0x50] sm:$0xff] }
  0x3b   :  { %257 = vperm.xlu0 %1809, %v196_v55  }
  0x3c   :  { %97 = vperm.xlu1 %1812, %v34_v54  }
  0x3f   :  { %260 = vperm.xlu0 %1809, %v197_v57   ;;  %v730_v57 = vld [vmem:[%s2789_s3 + $0x60] sm:$0xff] }
  0x40   :  { %100 = vperm.xlu1 %1812, %v35_v56   ;;  %v1793_v56 = vpack.c.bf16 %v729_v53, %v728_v52 }
  0x42   :  { %1794 = vmatprep.subr.bf16.mxu1 %v1793_v56 }
  0x43   :  { %263 = vperm.xlu0 %1809, %v198_v59   ;;  %1796 = vmatpush3.bf16.msra.mxu1 %v1793_v56 }
  0x44   :  { %103 = vperm.xlu1 %1812, %v36_v58   ;;  %v731_v58 = vld [vmem:[%s2789_s3 + $0x68] sm:$0xff] }
  0x47   :  { %266 = vperm.xlu0 %1809, %v199_v61   ;;  %v1797_v61 = vpack.c.bf16 %v731_v58, %v730_v57 }
  0x48   :  { %106 = vperm.xlu1 %1812, %v37_v60  }
  0x49   :  { %1798 = vmatprep.subr.bf16.mxu1 %v1797_v61 }
  0x4a   :  { %1800 = vmatpush3.bf16.msra.mxu1 %v1797_v61 }
  0x4b   :  { %269 = vperm.xlu0 %1809, %v200_v63   ;;  %1802 = vmatprep.subr.bf16.mxu1 %v1801_v37 }
  0x4c   :  { %109 = vperm.xlu1 %1812, %v38_v62  }
  0x4e   :  { %1804 = vmatpush3.bf16.msra.mxu1 %v1801_v37 }
  0x4f   :  { %272 = vperm.xlu0 %1809, %v201_v1  }
  0x50   :  { %112 = vperm.xlu1 %1812, %v39_v0  }
  0x53   :  { %275 = vperm.xlu0 %1809, %v202_v3  }
  0x54   :  { %115 = vperm.xlu1 %1812, %v40_v2  }
  0x57   :  { %278 = vperm.xlu0 %1809, %v203_v5  }
  0x58   :  { %118 = vperm.xlu1 %1812, %v41_v4  }
  0x5b   :  { %281 = vperm.xlu0 %1809, %v204_v7  }
  0x5c   :  { %121 = vperm.xlu1 %1812, %v42_v6  }
  0x5f   :  { %284 = vperm.xlu0 %1809, %v205_v9  }
  0x60   :  { %124 = vperm.xlu1 %1812, %v43_v8  }
  0x63   :  { %287 = vperm.xlu0 %1809, %v206_v11  }
  0x64   :  { %127 = vperm.xlu1 %1812, %v44_v10  }
  0x67   :  { %290 = vperm.xlu0 %1809, %v207_v13  }
  0x68   :  { %130 = vperm.xlu1 %1812, %v45_v12  }
  0x6b   :  { %293 = vperm.xlu0 %1809, %v208_v15  }
  0x6c   :  { %133 = vperm.xlu1 %1812, %v46_v14  }
  0x6f   :  { %296 = vperm.xlu0 %1809, %v209_v17  }
  0x70   :  { %136 = vperm.xlu1 %1812, %v47_v16  }
  0x73   :  { %299 = vperm.xlu0 %1809, %v210_v19  }
  0x74   :  { %139 = vperm.xlu1 %1812, %v48_v18  }
  0x77   :  { %302 = vperm.xlu0 %1809, %v211_v21  }
  0x78   :  { %142 = vperm.xlu1 %1812, %v49_v20  }
  0x7b   :  { %305 = vperm.xlu0 %1809, %v212_v23  }
  0x7c   :  { %145 = vperm.xlu1 %1812, %v50_v22  }
  0x7f   :  { %308 = vperm.xlu0 %1809, %v213_v25  }
  0x80   :  { %148 = vperm.xlu1 %1812, %v51_v24  }
  0x81   :  { %v59_v27 = vpop.permute.xlu1 %58  ;;  %v56_v28 = vpop.permute.xlu0 %55 }
  0x82   :  { %vm151_vm0 = vcmp.eq.s32.totalorder %v2118_v29, %v59_v27  ;;  %vm150_vm4 = vcmp.eq.s32.totalorder %v2118_v29, %v56_v28 }
  0x86   :  { %v219_v38 = vpop.permute.xlu1 %218  ;;  %v216_v39 = vpop.permute.xlu0 %215 }
  0x87   :  { %vm311_vm1 = vcmp.eq.s32.totalorder %v2118_v29, %v219_v38  ;;  %vm310_vm2 = vcmp.eq.s32.totalorder %v2118_v29, %v216_v39 }
  0x88   :  { %vm343_vm3 = vmor %vm151_vm0, %vm311_vm1 }
  0x89   :  { %vm342_vm5 = vmor %vm150_vm4, %vm310_vm2 }
  0x8a   :  { %1613 = vmatprep.mubr.msk.f32.mxu0 %vm342_vm5, %v1943_v43  ;;  %v222_v44 = vpop.permute.xlu0 %221 }
  0x8b   :  { %1614 = vmatmul.mubr.msk.f32.vlgmr.msra.gmra.mrb[0].mxu0 %vm343_vm3, %v1943_v43  ;;  %vm312_vm6 = vcmp.eq.s32.totalorder %v2118_v29, %v222_v44  ;;  %v62_v45 = vpop.permute.xlu1 %61 }
  0x8c   :  { %vm152_vm7 = vcmp.eq.s32.totalorder %v2118_v29, %v62_v45 }
  0x8d   :  { %vm344_vm8 = vmor %vm152_vm7, %vm312_vm6 }
  0x8e   :  { %1616 = vmatprep.mubr.msk.f32.mxu0 %vm344_vm8, %v1943_v43  ;;  %v225_v49 = vpop.permute.xlu0 %224 }
  0x8f   :  { %vm313_vm9 = vcmp.eq.s32.totalorder %v2118_v29, %v225_v49  ;;  %v65_v50 = vpop.permute.xlu1 %64 }
  0x90   :  { %vm153_vm10 = vcmp.eq.s32.totalorder %v2118_v29, %v65_v50 }
  0x91   :  { %vm345_vm11 = vmor %vm153_vm10, %vm313_vm9 }
  0x92   :  { %1617 = vmatmul.mubr.msk.f32.gmra.mrb[2].mxu0 %vm345_vm11, %v1943_v43  ;;  %v228_v54 = vpop.permute.xlu0 %227 }
  0x93   :  { %vm314_vm12 = vcmp.eq.s32.totalorder %v2118_v29, %v228_v54  ;;  %v68_v55 = vpop.permute.xlu1 %67 }
  0x94   :  { %vm154_vm13 = vcmp.eq.s32.totalorder %v2118_v29, %v68_v55  ;;  %v2267_v55 = vld [vmem:[%s2790_s2] ss:$0 sm:$0xff] }
  0x95   :  { %vm346_vm14 = vmor %vm154_vm13, %vm314_vm12 }
  0x96   :  { %1619 = vmatprep.mubr.msk.f32.mxu0 %vm346_vm14, %v1943_v43  ;;  %v231_v59 = vpop.permute.xlu0 %230 }
  0x97   :  { %vm315_vm15 = vcmp.eq.s32.totalorder %v2118_v29, %v231_v59  ;;  %v71_v60 = vpop.permute.xlu1 %70 }
  0x98   :  { %vm155_vm0 = vcmp.eq.s32.totalorder %v2118_v29, %v71_v60 }
  0x99   :  { %vm347_vm1 = vmor %vm155_vm0, %vm315_vm15 }
  0x9a   :  { %1620 = vmatmul.mubr.msk.f32.gmra.mrb[4].mxu0 %vm347_vm1, %v1943_v43  ;;  %v234_v62 = vpop.permute.xlu0 %233 }
  0x9b   :  { %vm316_vm2 = vcmp.eq.s32.totalorder %v2118_v29, %v234_v62  ;;  %v74_v63 = vpop.permute.xlu1 %73 }
  0x9c   :  { %vm156_vm3 = vcmp.eq.s32.totalorder %v2118_v29, %v74_v63 }
  0x9d   :  { %vm348_vm4 = vmor %vm156_vm3, %vm316_vm2 }
  0x9e   :  { %1622 = vmatprep.mubr.msk.f32.mxu0 %vm348_vm4, %v1943_v43  ;;  %v237_v0 = vpop.permute.xlu0 %236 }
  0x9f   :  { %vm317_vm5 = vcmp.eq.s32.totalorder %v2118_v29, %v237_v0  ;;  %v77_v1 = vpop.permute.xlu1 %76 }
  0xa0   :  { %vm157_vm6 = vcmp.eq.s32.totalorder %v2118_v29, %v77_v1 }
  0xa1   :  { %vm349_vm7 = vmor %vm157_vm6, %vm317_vm5 }
  0xa2   :  { %1623 = vmatmul.mubr.msk.f32.gmra.mrb[6].mxu0 %vm349_vm7, %v1943_v43  ;;  %v240_v2 = vpop.permute.xlu0 %239 }
  0xa3   :  { %vm318_vm8 = vcmp.eq.s32.totalorder %v2118_v29, %v240_v2  ;;  %v80_v3 = vpop.permute.xlu1 %79 }
  0xa4   :  { %vm158_vm9 = vcmp.eq.s32.totalorder %v2118_v29, %v80_v3 }
  0xa5   :  { %vm350_vm10 = vmor %vm158_vm9, %vm318_vm8 }
  0xa6   :  { %1625 = vmatprep.mubr.msk.f32.mxu0 %vm350_vm10, %v1943_v43  ;;  %v243_v4 = vpop.permute.xlu0 %242 }
  0xa7   :  { %vm319_vm11 = vcmp.eq.s32.totalorder %v2118_v29, %v243_v4  ;;  %v83_v5 = vpop.permute.xlu1 %82 }
  0xa8   :  { %vm159_vm12 = vcmp.eq.s32.totalorder %v2118_v29, %v83_v5 }
  0xa9   :  { %vm351_vm13 = vmor %vm159_vm12, %vm319_vm11 }
  0xaa   :  { %1626 = vmatmul.mubr.msk.f32.gmra.mrb[8].mxu0 %vm351_vm13, %v1943_v43  ;;  %v246_v6 = vpop.permute.xlu0 %245 }
  0xab   :  { %vm320_vm14 = vcmp.eq.s32.totalorder %v2118_v29, %v246_v6  ;;  %v86_v7 = vpop.permute.xlu1 %85 }
  0xac   :  { %vm160_vm15 = vcmp.eq.s32.totalorder %v2118_v29, %v86_v7 }
  0xad   :  { %vm352_vm0 = vmor %vm160_vm15, %vm320_vm14 }
  0xae   :  { %1628 = vmatprep.mubr.msk.f32.mxu0 %vm352_vm0, %v1943_v43  ;;  %v249_v8 = vpop.permute.xlu0 %248 }
  0xaf   :  { %vm321_vm1 = vcmp.eq.s32.totalorder %v2118_v29, %v249_v8  ;;  %v89_v9 = vpop.permute.xlu1 %88 }
  0xb0   :  { %vm161_vm2 = vcmp.eq.s32.totalorder %v2118_v29, %v89_v9 }
  0xb1   :  { %vm353_vm3 = vmor %vm161_vm2, %vm321_vm1 }
  0xb2   :  { %1629 = vmatmul.mubr.msk.f32.gmra.mrb[10].mxu0 %vm353_vm3, %v1943_v43  ;;  %v252_v10 = vpop.permute.xlu0 %251 }
  0xb3   :  { %vm322_vm4 = vcmp.eq.s32.totalorder %v2118_v29, %v252_v10  ;;  %v92_v11 = vpop.permute.xlu1 %91 }
  0xb4   :  { %vm162_vm5 = vcmp.eq.s32.totalorder %v2118_v29, %v92_v11 }
  0xb5   :  { %vm354_vm6 = vmor %vm162_vm5, %vm322_vm4 }
  0xb6   :  { %1631 = vmatprep.mubr.msk.f32.mxu0 %vm354_vm6, %v1943_v43  ;;  %v255_v12 = vpop.permute.xlu0 %254 }
  0xb7   :  { %vm323_vm7 = vcmp.eq.s32.totalorder %v2118_v29, %v255_v12  ;;  %v95_v13 = vpop.permute.xlu1 %94 }
  0xb8   :  { %vm163_vm8 = vcmp.eq.s32.totalorder %v2118_v29, %v95_v13 }
  0xb9   :  { %vm355_vm9 = vmor %vm163_vm8, %vm323_vm7 }
  0xba   :  { %1632 = vmatmul.mubr.msk.f32.gmra.mrb[12].mxu0 %vm355_vm9, %v1943_v43  ;;  %v258_v14 = vpop.permute.xlu0 %257 }
  0xbb   :  { %vm324_vm10 = vcmp.eq.s32.totalorder %v2118_v29, %v258_v14  ;;  %v98_v15 = vpop.permute.xlu1 %97 }
  0xbc   :  { %vm164_vm11 = vcmp.eq.s32.totalorder %v2118_v29, %v98_v15 }
  0xbd   :  { %vm356_vm12 = vmor %vm164_vm11, %vm324_vm10 }
  0xbe   :  { %1634 = vmatprep.mubr.msk.f32.mxu0 %vm356_vm12, %v1943_v43  ;;  %v261_v16 = vpop.permute.xlu0 %260 }
  0xbf   :  { %vm325_vm13 = vcmp.eq.s32.totalorder %v2118_v29, %v261_v16  ;;  %v101_v17 = vpop.permute.xlu1 %100 }
  0xc0   :  { %vm165_vm14 = vcmp.eq.s32.totalorder %v2118_v29, %v101_v17 }
  0xc1   :  { %vm357_vm15 = vmor %vm165_vm14, %vm325_vm13 }
  0xc2   :  { %1635 = vmatmul.mubr.msk.f32.gmra.mrb[14].mxu0 %vm357_vm15, %v1943_v43  ;;  %v264_v18 = vpop.permute.xlu0 %263 }
  0xc3   :  { %vm326_vm0 = vcmp.eq.s32.totalorder %v2118_v29, %v264_v18  ;;  %v104_v19 = vpop.permute.xlu1 %103 }
  0xc4   :  { %vm166_vm1 = vcmp.eq.s32.totalorder %v2118_v29, %v104_v19 }
  0xc5   :  { %vm358_vm2 = vmor %vm166_vm1, %vm326_vm0 }
  0xc6   :  { %1637 = vmatprep.mubr.msk.f32.mxu0 %vm358_vm2, %v1943_v43  ;;  %v267_v20 = vpop.permute.xlu0 %266 }
  0xc7   :  { %vm327_vm3 = vcmp.eq.s32.totalorder %v2118_v29, %v267_v20  ;;  %v107_v21 = vpop.permute.xlu1 %106 }
  0xc8   :  { %vm167_vm4 = vcmp.eq.s32.totalorder %v2118_v29, %v107_v21 }
  0xc9   :  { %vm359_vm5 = vmor %vm167_vm4, %vm327_vm3 }
  0xca   :  { %1638 = vmatmul.mubr.msk.f32.gmra.mrb[16].mxu0 %vm359_vm5, %v1943_v43  ;;  %v270_v22 = vpop.permute.xlu0 %269 }
  0xcb   :  { %vm328_vm6 = vcmp.eq.s32.totalorder %v2118_v29, %v270_v22  ;;  %v110_v23 = vpop.permute.xlu1 %109 }
  0xcc   :  { %vm168_vm7 = vcmp.eq.s32.totalorder %v2118_v29, %v110_v23 }
  0xcd   :  { %vm360_vm8 = vmor %vm168_vm7, %vm328_vm6 }
  0xce   :  { %1640 = vmatprep.mubr.msk.f32.mxu0 %vm360_vm8, %v1943_v43  ;;  %v273_v24 = vpop.permute.xlu0 %272 }
  0xcf   :  { %vm329_vm9 = vcmp.eq.s32.totalorder %v2118_v29, %v273_v24  ;;  %v113_v25 = vpop.permute.xlu1 %112 }
  0xd0   :  { %vm169_vm10 = vcmp.eq.s32.totalorder %v2118_v29, %v113_v25 }
  0xd1   :  { %vm361_vm11 = vmor %vm169_vm10, %vm329_vm9 }
  0xd2   :  { %1641 = vmatmul.mubr.msk.f32.gmra.mrb[18].mxu0 %vm361_vm11, %v1943_v43  ;;  %v276_v26 = vpop.permute.xlu0 %275 }
  0xd3   :  { %vm330_vm12 = vcmp.eq.s32.totalorder %v2118_v29, %v276_v26  ;;  %v116_v27 = vpop.permute.xlu1 %115 }
  0xd4   :  { %vm170_vm13 = vcmp.eq.s32.totalorder %v2118_v29, %v116_v27 }
  0xd5   :  { %vm362_vm14 = vmor %vm170_vm13, %vm330_vm12 }
  0xd6   :  { %1643 = vmatprep.mubr.msk.f32.mxu0 %vm362_vm14, %v1943_v43  ;;  %v279_v28 = vpop.permute.xlu0 %278 }
  0xd7   :  { %vm331_vm15 = vcmp.eq.s32.totalorder %v2118_v29, %v279_v28  ;;  %v119_v30 = vpop.permute.xlu1 %118 }
  0xd8   :  { %vm171_vm0 = vcmp.eq.s32.totalorder %v2118_v29, %v119_v30 }
  0xd9   :  { %vm363_vm1 = vmor %vm171_vm0, %vm331_vm15 }
  0xda   :  { %1644 = vmatmul.mubr.msk.f32.gmra.mrb[20].mxu0 %vm363_vm1, %v1943_v43  ;;  %v282_v31 = vpop.permute.xlu0 %281 }
  0xdb   :  { %vm332_vm2 = vcmp.eq.s32.totalorder %v2118_v29, %v282_v31  ;;  %v122_v32 = vpop.permute.xlu1 %121 }
  0xdc   :  { %vm172_vm3 = vcmp.eq.s32.totalorder %v2118_v29, %v122_v32 }
  0xdd   :  { %vm364_vm4 = vmor %vm172_vm3, %vm332_vm2 }
  0xde   :  { %1646 = vmatprep.mubr.msk.f32.mxu0 %vm364_vm4, %v1943_v43  ;;  %v285_v33 = vpop.permute.xlu0 %284 }
  0xdf   :  { %vm333_vm5 = vcmp.eq.s32.totalorder %v2118_v29, %v285_v33  ;;  %v125_v36 = vpop.permute.xlu1 %124 }
  0xe0   :  { %vm173_vm6 = vcmp.eq.s32.totalorder %v2118_v29, %v125_v36 }
  0xe1   :  { %vm365_vm7 = vmor %vm173_vm6, %vm333_vm5 }
  0xe2   :  { %1647 = vmatmul.mubr.msk.f32.gmra.mrb[22].mxu0 %vm365_vm7, %v1943_v43  ;;  %v288_v38 = vpop.permute.xlu0 %287 }
  0xe3   :  { %vm334_vm8 = vcmp.eq.s32.totalorder %v2118_v29, %v288_v38  ;;  %v128_v39 = vpop.permute.xlu1 %127 }
  0xe4   :  { %vm174_vm9 = vcmp.eq.s32.totalorder %v2118_v29, %v128_v39 }
  0xe5   :  { %vm366_vm10 = vmor %vm174_vm9, %vm334_vm8 }
  0xe6   :  { %1649 = vmatprep.mubr.msk.f32.mxu0 %vm366_vm10, %v1943_v43  ;;  %v291_v40 = vpop.permute.xlu0 %290 }
  0xe7   :  { %vm335_vm11 = vcmp.eq.s32.totalorder %v2118_v29, %v291_v40  ;;  %v131_v41 = vpop.permute.xlu1 %130 }
  0xe8   :  { %vm175_vm12 = vcmp.eq.s32.totalorder %v2118_v29, %v131_v41 }
  0xe9   :  { %vm367_vm13 = vmor %vm175_vm12, %vm335_vm11 }
  0xea   :  { %1650 = vmatmul.mubr.msk.f32.gmra.mrb[24].mxu0 %vm367_vm13, %v1943_v43  ;;  %v294_v42 = vpop.permute.xlu0 %293 }
  0xeb   :  { %vm336_vm14 = vcmp.eq.s32.totalorder %v2118_v29, %v294_v42  ;;  %v134_v44 = vpop.permute.xlu1 %133 }
  0xec   :  { %vm176_vm15 = vcmp.eq.s32.totalorder %v2118_v29, %v134_v44 }
  0xed   :  { %vm368_vm0 = vmor %vm176_vm15, %vm336_vm14 }
  0xee   :  { %1652 = vmatprep.mubr.msk.f32.mxu0 %vm368_vm0, %v1943_v43  ;;  %v297_v45 = vpop.permute.xlu0 %296  ;;  %vm998_vm0 = vcmp.lt.s32.totalorder %v2118_v29, 32 }
  0xef   :  { %vm337_vm1 = vcmp.eq.s32.totalorder %v2118_v29, %v297_v45  ;;  %v137_v46 = vpop.permute.xlu1 %136 }
  0xf0   :  { %vm177_vm2 = vcmp.eq.s32.totalorder %v2118_v29, %v137_v46 }
  0xf1   :  { %vm369_vm3 = vmor %vm177_vm2, %vm337_vm1 }
  0xf2   :  { %1653 = vmatmul.mubr.msk.f32.gmra.mrb[26].mxu0 %vm369_vm3, %v1943_v43  ;;  %v300_v47 = vpop.permute.xlu0 %299 }
  0xf3   :  { %vm338_vm4 = vcmp.eq.s32.totalorder %v2118_v29, %v300_v47  ;;  %v140_v48 = vpop.permute.xlu1 %139 }
  0xf4   :  { %vm178_vm5 = vcmp.eq.s32.totalorder %v2118_v29, %v140_v48 }
  0xf5   :  { %vm370_vm6 = vmor %vm178_vm5, %vm338_vm4 }
  0xf6   :  { %1655 = vmatprep.mubr.msk.f32.mxu0 %vm370_vm6, %v1943_v43  ;;  %v303_v49 = vpop.permute.xlu0 %302 }
  0xf7   :  { %vm339_vm7 = vcmp.eq.s32.totalorder %v2118_v29, %v303_v49  ;;  %v143_v50 = vpop.permute.xlu1 %142 }
  0xf8   :  { %vm179_vm8 = vcmp.eq.s32.totalorder %v2118_v29, %v143_v50 }
  0xf9   :  { %vm371_vm9 = vmor %vm179_vm8, %vm339_vm7 }
  0xfa   :  { %1656 = vmatmul.mubr.msk.f32.gmra.mrb[28].mxu0 %vm371_vm9, %v1943_v43  ;;  %v306_v51 = vpop.permute.xlu0 %305 }
  0xfb   :  { %vm340_vm10 = vcmp.eq.s32.totalorder %v2118_v29, %v306_v51  ;;  %v146_v52 = vpop.permute.xlu1 %145 }
  0xfc   :  { %vm180_vm11 = vcmp.eq.s32.totalorder %v2118_v29, %v146_v52 }
  0xfd   :  { %vm372_vm12 = vmor %vm180_vm11, %vm340_vm10 }
  0xfe   :  { %1658 = vmatprep.mubr.msk.f32.mxu0 %vm372_vm12, %v1943_v43  ;;  %v309_v53 = vpop.permute.xlu0 %308 }
  0xff   :  { %vm341_vm13 = vcmp.eq.s32.totalorder %v2118_v29, %v309_v53  ;;  %v149_v54 = vpop.permute.xlu1 %148 }
 0x100   :  { %vm181_vm14 = vcmp.eq.s32.totalorder %v2118_v29, %v149_v54 }
 0x101   :  { %vm373_vm15 = vmor %vm181_vm14, %vm341_vm13 }
 0x102   :  { %1659 = vmatmul.mubr.msk.f32.gmra.mrb[30].mxu0 %vm373_vm15, %v1943_v43 }
 0x15e   :  { %v1615_v56 = vpop.f32.mrb[0].mxu0 }
 0x15f   :  { %v533_v57 = vadd.f32 %v1615_v56, %v2267_v55  ;;  %v527_v58 = vpop.f32.mrb[1].mxu0 }
 0x160   :  { %v528_v59 = vadd.f32 %v2267_v55, %v527_v58 }
 0x161   :  { %v687_v61 = vmax.f32 %v533_v57, 0.0 }
 0x162   :  { %v686_v60 = vmax.f32 %v528_v59, 0.0 }
 0x164   :  { %1693 = vmatprep.mubr.f32.mxu1 %v686_v60 }
 0x165   :  { %1694 = vmatmul.mubr.f32.vlgmr.msra.gmra.mrb[0].mxu1 %v687_v61  ;;  %v1618_v62 = vpop.f32.mrb[2].mxu0 }
 0x166   :  { %v543_v63 = vadd.f32 %v1618_v62, %v2267_v55  ;;  %v537_v0 = vpop.f32.mrb[3].mxu0 }
 0x167   :  { %v538_v43 = vadd.f32 %v2267_v55, %v537_v0 }
 0x168   :  { %v689_v2 = vmax.f32 %v543_v63, 0.0 }
 0x169   :  { %v688_v1 = vmax.f32 %v538_v43, 0.0 }
 0x16b   :  { %1696 = vmatprep.mubr.f32.mxu1 %v688_v1 }
 0x16c   :  { %1697 = vmatmul.mubr.f32.gmra.mrb[2].mxu1 %v689_v2 }
 0x16d   :  { %v1621_v3 = vpop.f32.mrb[4].mxu0 }
 0x16e   :  { %v553_v4 = vadd.f32 %v1621_v3, %v2267_v55  ;;  %v547_v5 = vpop.f32.mrb[5].mxu0 }
 0x16f   :  { %v548_v6 = vadd.f32 %v2267_v55, %v547_v5 }
 0x170   :  { %v691_v8 = vmax.f32 %v553_v4, 0.0 }
 0x171   :  { %v690_v7 = vmax.f32 %v548_v6, 0.0 }
 0x173   :  { %1699 = vmatprep.mubr.f32.mxu1 %v690_v7 }
 0x174   :  { %1700 = vmatmul.mubr.f32.gmra.mrb[4].mxu1 %v691_v8 }
 0x175   :  { %v1624_v9 = vpop.f32.mrb[6].mxu0 }
 0x176   :  { %v563_v10 = vadd.f32 %v1624_v9, %v2267_v55  ;;  %v557_v11 = vpop.f32.mrb[7].mxu0 }
 0x177   :  { %v558_v12 = vadd.f32 %v2267_v55, %v557_v11 }
 0x178   :  { %v693_v14 = vmax.f32 %v563_v10, 0.0 }
 0x179   :  { %v692_v13 = vmax.f32 %v558_v12, 0.0 }
 0x17b   :  { %1702 = vmatprep.mubr.f32.mxu1 %v692_v13 }
 0x17c   :  { %1703 = vmatmul.mubr.f32.gmra.mrb[6].mxu1 %v693_v14 }
 0x17d   :  { %v1627_v15 = vpop.f32.mrb[8].mxu0 }
 0x17e   :  { %v573_v16 = vadd.f32 %v1627_v15, %v2267_v55  ;;  %v567_v17 = vpop.f32.mrb[9].mxu0 }
 0x17f   :  { %v568_v18 = vadd.f32 %v2267_v55, %v567_v17 }
 0x180   :  { %v695_v20 = vmax.f32 %v573_v16, 0.0 }
 0x181   :  { %v694_v19 = vmax.f32 %v568_v18, 0.0 }
 0x183   :  { %1705 = vmatprep.mubr.f32.mxu1 %v694_v19 }
 0x184   :  { %1706 = vmatmul.mubr.f32.gmra.mrb[8].mxu1 %v695_v20 }
 0x185   :  { %v1630_v21 = vpop.f32.mrb[10].mxu0 }
 0x186   :  { %v583_v22 = vadd.f32 %v1630_v21, %v2267_v55  ;;  %v577_v23 = vpop.f32.mrb[11].mxu0 }
 0x187   :  { %v578_v24 = vadd.f32 %v2267_v55, %v577_v23 }
 0x188   :  { %v697_v26 = vmax.f32 %v583_v22, 0.0 }
 0x189   :  { %v696_v25 = vmax.f32 %v578_v24, 0.0 }
 0x18b   :  { %1708 = vmatprep.mubr.f32.mxu1 %v696_v25  ;;  %v2304_v25 = vld [vmem:[%s2791_s4] ss:$0 sm:$0xff] }
 0x18c   :  { %1709 = vmatmul.mubr.f32.gmra.mrb[10].mxu1 %v697_v26 }
 0x18d   :  { %v1633_v27 = vpop.f32.mrb[12].mxu0 }
 0x18e   :  { %v593_v28 = vadd.f32 %v1633_v27, %v2267_v55  ;;  %v587_v30 = vpop.f32.mrb[13].mxu0 }
 0x18f   :  { %v588_v31 = vadd.f32 %v2267_v55, %v587_v30 }
 0x190   :  { %v699_v33 = vmax.f32 %v593_v28, 0.0 }
 0x191   :  { %v698_v32 = vmax.f32 %v588_v31, 0.0 }
 0x193   :  { %1711 = vmatprep.mubr.f32.mxu1 %v698_v32 }
 0x194   :  { %1712 = vmatmul.mubr.f32.gmra.mrb[12].mxu1 %v699_v33 }
 0x195   :  { %v1636_v34 = vpop.f32.mrb[14].mxu0 }
 0x196   :  { %v603_v35 = vadd.f32 %v1636_v34, %v2267_v55  ;;  %v597_v36 = vpop.f32.mrb[15].mxu0 }
 0x197   :  { %v598_v37 = vadd.f32 %v2267_v55, %v597_v36 }
 0x198   :  { %v701_v39 = vmax.f32 %v603_v35, 0.0 }
 0x199   :  { %v700_v38 = vmax.f32 %v598_v37, 0.0 }
 0x19b   :  { %1714 = vmatprep.mubr.f32.mxu1 %v700_v38 }
 0x19c   :  { %1715 = vmatmul.mubr.f32.gmra.mrb[14].mxu1 %v701_v39 }
 0x19d   :  { %v1639_v40 = vpop.f32.mrb[16].mxu0 }
 0x19e   :  { %v613_v41 = vadd.f32 %v1639_v40, %v2267_v55  ;;  %v607_v42 = vpop.f32.mrb[17].mxu0 }
 0x19f   :  { %v608_v44 = vadd.f32 %v2267_v55, %v607_v42 }
 0x1a0   :  { %v703_v46 = vmax.f32 %v613_v41, 0.0 }
 0x1a1   :  { %v702_v45 = vmax.f32 %v608_v44, 0.0 }
 0x1a3   :  { %1717 = vmatprep.mubr.f32.mxu1 %v702_v45 }
 0x1a4   :  { %1718 = vmatmul.mubr.f32.gmra.mrb[16].mxu1 %v703_v46 }
 0x1a5   :  { %v1642_v47 = vpop.f32.mrb[18].mxu0 }
 0x1a6   :  { %v623_v48 = vadd.f32 %v1642_v47, %v2267_v55  ;;  %v617_v49 = vpop.f32.mrb[19].mxu0 }
 0x1a7   :  { %v618_v50 = vadd.f32 %v2267_v55, %v617_v49 }
 0x1a8   :  { %v705_v52 = vmax.f32 %v623_v48, 0.0 }
 0x1a9   :  { %v704_v51 = vmax.f32 %v618_v50, 0.0 }
 0x1ab   :  { %1720 = vmatprep.mubr.f32.mxu1 %v704_v51 }
 0x1ac   :  { %1721 = vmatmul.mubr.f32.gmra.mrb[18].mxu1 %v705_v52 }
 0x1ad   :  { %v1645_v53 = vpop.f32.mrb[20].mxu0 }
 0x1ae   :  { %v633_v54 = vadd.f32 %v1645_v53, %v2267_v55  ;;  %v627_v56 = vpop.f32.mrb[21].mxu0 }
 0x1af   :  { %v628_v57 = vadd.f32 %v2267_v55, %v627_v56 }
 0x1b0   :  { %v707_v59 = vmax.f32 %v633_v54, 0.0 }
 0x1b1   :  { %v706_v58 = vmax.f32 %v628_v57, 0.0 }
 0x1b3   :  { %1723 = vmatprep.mubr.f32.mxu1 %v706_v58 }
 0x1b4   :  { %1724 = vmatmul.mubr.f32.gmra.mrb[20].mxu1 %v707_v59 }
 0x1b5   :  { %v1648_v60 = vpop.f32.mrb[22].mxu0 }
 0x1b6   :  { %v643_v61 = vadd.f32 %v1648_v60, %v2267_v55  ;;  %v637_v62 = vpop.f32.mrb[23].mxu0 }
 0x1b7   :  { %v638_v63 = vadd.f32 %v2267_v55, %v637_v62 }
 0x1b8   :  { %v709_v43 = vmax.f32 %v643_v61, 0.0 }
 0x1b9   :  { %v708_v0 = vmax.f32 %v638_v63, 0.0 }
 0x1bb   :  { %1726 = vmatprep.mubr.f32.mxu1 %v708_v0 }
 0x1bc   :  { %1727 = vmatmul.mubr.f32.gmra.mrb[22].mxu1 %v709_v43 }
 0x1bd   :  { %v1651_v1 = vpop.f32.mrb[24].mxu0 }
 0x1be   :  { %v653_v2 = vadd.f32 %v1651_v1, %v2267_v55  ;;  %v647_v3 = vpop.f32.mrb[25].mxu0 }
 0x1bf   :  { %v648_v4 = vadd.f32 %v2267_v55, %v647_v3 }
 0x1c0   :  { %v711_v6 = vmax.f32 %v653_v2, 0.0 }
 0x1c1   :  { %v710_v5 = vmax.f32 %v648_v4, 0.0 }
 0x1c3   :  { %1729 = vmatprep.mubr.f32.mxu1 %v710_v5 }
 0x1c4   :  { %1730 = vmatmul.mubr.f32.gmra.mrb[24].mxu1 %v711_v6 }
 0x1c5   :  { %v1654_v7 = vpop.f32.mrb[26].mxu0 }
 0x1c6   :  { %v663_v8 = vadd.f32 %v1654_v7, %v2267_v55  ;;  %v657_v9 = vpop.f32.mrb[27].mxu0 }
 0x1c7   :  { %v658_v10 = vadd.f32 %v2267_v55, %v657_v9 }
 0x1c8   :  { %v713_v12 = vmax.f32 %v663_v8, 0.0 }
 0x1c9   :  { %v712_v11 = vmax.f32 %v658_v10, 0.0 }
 0x1cb   :  { %1732 = vmatprep.mubr.f32.mxu1 %v712_v11 }
 0x1cc   :  { %1733 = vmatmul.mubr.f32.gmra.mrb[26].mxu1 %v713_v12 }
 0x1cd   :  { %v1657_v13 = vpop.f32.mrb[28].mxu0 }
 0x1ce   :  { %v673_v14 = vadd.f32 %v1657_v13, %v2267_v55  ;;  %v667_v15 = vpop.f32.mrb[29].mxu0 }
 0x1cf   :  { %v668_v16 = vadd.f32 %v2267_v55, %v667_v15 }
 0x1d0   :  { %v715_v18 = vmax.f32 %v673_v14, 0.0 }
 0x1d1   :  { %v714_v17 = vmax.f32 %v668_v16, 0.0 }
 0x1d3   :  { %1735 = vmatprep.mubr.f32.mxu1 %v714_v17 }
 0x1d4   :  { %1736 = vmatmul.mubr.f32.gmra.mrb[28].mxu1 %v715_v18 }
 0x1d5   :  { %v1660_v19 = vpop.f32.mrb[30].mxu0 }
 0x1d6   :  { %v683_v20 = vadd.f32 %v1660_v19, %v2267_v55  ;;  %v677_v21 = vpop.f32.mrb[31].mxu0 }
 0x1d7   :  { %v678_v22 = vadd.f32 %v2267_v55, %v677_v21 }
 0x1d8   :  { %v717_v24 = vmax.f32 %v683_v20, 0.0 }
 0x1d9   :  { %v716_v23 = vmax.f32 %v678_v22, 0.0 }
 0x1db   :  { %1738 = vmatprep.mubr.f32.mxu1 %v716_v23 }
 0x1dc   :  { %1739 = vmatmul.mubr.f32.gmra.mrb[30].mxu1 %v717_v24 }
 0x238   :  { %v1695_v26 = vpop.f32.mrb[0].mxu1 }
 0x239   :  { %v813_v27 = vadd.f32 %v1695_v26, %v2304_v25  ;;  %v807_v28 = vpop.f32.mrb[1].mxu1 }
 0x23a   :  { %v808_v30 = vadd.f32 %v2304_v25, %v807_v28 }
 0x23b   :  { %v967_v31 = vmax.f32 %v813_v27, 0.0 }
 0x23c   :  { %v966_v32 = vmax.f32 %v808_v30, 0.0 }
 0x23d   :  { %v2311_v55 = vsel %vm998_vm0, %v967_v31, -inf }
 0x23e   :  { %1033 = vmax.xlane.f32.xlu0 %v2311_v55  ;;  %v2316_v33 = vsel %vm998_vm0, %v966_v32, -inf }
 0x23f   :  { %1031 = vmax.xlane.f32.xlu1 %v2316_v33  ;;  %v1698_v34 = vpop.f32.mrb[2].mxu1 }
 0x240   :  { %v823_v35 = vadd.f32 %v1698_v34, %v2304_v25  ;;  %v817_v36 = vpop.f32.mrb[3].mxu1 }
 0x241   :  { %v818_v37 = vadd.f32 %v2304_v25, %v817_v36 }
 0x242   :  { %v969_v38 = vmax.f32 %v823_v35, 0.0 }
 0x243   :  { %v968_v39 = vmax.f32 %v818_v37, 0.0 }
 0x244   :  { %v2323_v40 = vsel %vm998_vm0, %v969_v38, -inf }
 0x245   :  { %1037 = vmax.xlane.f32.xlu1 %v2323_v40  ;;  %v2328_v41 = vsel %vm998_vm0, %v968_v39, -inf }
 0x246   :  { %1035 = vmax.xlane.f32.xlu0 %v2328_v41 }
 0x247   :  { %v1701_v42 = vpop.f32.mrb[4].mxu1 }
 0x248   :  { %v833_v44 = vadd.f32 %v1701_v42, %v2304_v25  ;;  %v827_v45 = vpop.f32.mrb[5].mxu1 }
 0x249   :  { %v828_v46 = vadd.f32 %v2304_v25, %v827_v45 }
 0x24a   :  { %v971_v47 = vmax.f32 %v833_v44, 0.0 }
 0x24b   :  { %v970_v48 = vmax.f32 %v828_v46, 0.0 }
 0x24c   :  { %v2335_v49 = vsel %vm998_vm0, %v971_v47, -inf }
 0x24d   :  { %1041 = vmax.xlane.f32.xlu1 %v2335_v49  ;;  %v2340_v50 = vsel %vm998_vm0, %v970_v48, -inf }
 0x24e   :  { %1039 = vmax.xlane.f32.xlu0 %v2340_v50 }
 0x24f   :  { %v1704_v51 = vpop.f32.mrb[6].mxu1 }
 0x250   :  { %v843_v52 = vadd.f32 %v1704_v51, %v2304_v25  ;;  %v837_v53 = vpop.f32.mrb[7].mxu1 }
 0x251   :  { %v838_v54 = vadd.f32 %v2304_v25, %v837_v53 }
 0x252   :  { %v973_v56 = vmax.f32 %v843_v52, 0.0 }
 0x253   :  { %v972_v57 = vmax.f32 %v838_v54, 0.0 }
 0x254   :  { %v2347_v58 = vsel %vm998_vm0, %v973_v56, -inf }
 0x255   :  { %1045 = vmax.xlane.f32.xlu1 %v2347_v58  ;;  %v2352_v59 = vsel %vm998_vm0, %v972_v57, -inf }
 0x256   :  { %1043 = vmax.xlane.f32.xlu0 %v2352_v59 }
 0x257   :  { %v1707_v60 = vpop.f32.mrb[8].mxu1 }
 0x258   :  { %v853_v61 = vadd.f32 %v1707_v60, %v2304_v25  ;;  %v847_v62 = vpop.f32.mrb[9].mxu1 }
 0x259   :  { %v848_v63 = vadd.f32 %v2304_v25, %v847_v62 }
 0x25a   :  { %v975_v0 = vmax.f32 %v853_v61, 0.0 }
 0x25b   :  { %v974_v43 = vmax.f32 %v848_v63, 0.0 }
 0x25c   :  { %v2359_v1 = vsel %vm998_vm0, %v975_v0, -inf }
 0x25d   :  { %1049 = vmax.xlane.f32.xlu1 %v2359_v1  ;;  %v2364_v2 = vsel %vm998_vm0, %v974_v43, -inf }
 0x25e   :  { %1047 = vmax.xlane.f32.xlu0 %v2364_v2 }
 0x25f   :  { %v1710_v3 = vpop.f32.mrb[10].mxu1 }
 0x260   :  { %v863_v4 = vadd.f32 %v1710_v3, %v2304_v25  ;;  %v857_v5 = vpop.f32.mrb[11].mxu1 }
 0x261   :  { %v858_v6 = vadd.f32 %v2304_v25, %v857_v5 }
 0x262   :  { %v977_v7 = vmax.f32 %v863_v4, 0.0 }
 0x263   :  { %v976_v8 = vmax.f32 %v858_v6, 0.0 }
 0x264   :  { %v2371_v9 = vsel %vm998_vm0, %v977_v7, -inf }
 0x265   :  { %1053 = vmax.xlane.f32.xlu1 %v2371_v9  ;;  %v2376_v10 = vsel %vm998_vm0, %v976_v8, -inf }
 0x266   :  { %1051 = vmax.xlane.f32.xlu0 %v2376_v10 }
 0x267   :  { %v1713_v11 = vpop.f32.mrb[12].mxu1 }
 0x268   :  { %v873_v12 = vadd.f32 %v1713_v11, %v2304_v25  ;;  %v867_v13 = vpop.f32.mrb[13].mxu1 }
 0x269   :  { %v868_v14 = vadd.f32 %v2304_v25, %v867_v13 }
 0x26a   :  { %v979_v15 = vmax.f32 %v873_v12, 0.0 }
 0x26b   :  { %v978_v16 = vmax.f32 %v868_v14, 0.0 }
 0x26c   :  { %v2383_v17 = vsel %vm998_vm0, %v979_v15, -inf }
 0x26d   :  { %1057 = vmax.xlane.f32.xlu1 %v2383_v17  ;;  %v2388_v18 = vsel %vm998_vm0, %v978_v16, -inf }
 0x26e   :  { %1055 = vmax.xlane.f32.xlu0 %v2388_v18 }
 0x26f   :  { %v1716_v19 = vpop.f32.mrb[14].mxu1 }
 0x270   :  { %v883_v20 = vadd.f32 %v1716_v19, %v2304_v25  ;;  %v877_v21 = vpop.f32.mrb[15].mxu1 }
 0x271   :  { %v878_v22 = vadd.f32 %v2304_v25, %v877_v21 }
 0x272   :  { %v981_v23 = vmax.f32 %v883_v20, 0.0 }
 0x273   :  { %v980_v24 = vmax.f32 %v878_v22, 0.0 }
 0x274   :  { %v2395_v26 = vsel %vm998_vm0, %v981_v23, -inf }
 0x275   :  { %1061 = vmax.xlane.f32.xlu1 %v2395_v26  ;;  %v2400_v27 = vsel %vm998_vm0, %v980_v24, -inf }
 0x276   :  { %1059 = vmax.xlane.f32.xlu0 %v2400_v27 }
 0x277   :  { %v1719_v28 = vpop.f32.mrb[16].mxu1 }
 0x278   :  { %v893_v30 = vadd.f32 %v1719_v28, %v2304_v25  ;;  %v887_v31 = vpop.f32.mrb[17].mxu1 }
 0x279   :  { %v888_v32 = vadd.f32 %v2304_v25, %v887_v31 }
 0x27a   :  { %v983_v34 = vmax.f32 %v893_v30, 0.0 }
 0x27b   :  { %v982_v35 = vmax.f32 %v888_v32, 0.0 }
 0x27c   :  { %v2407_v36 = vsel %vm998_vm0, %v983_v34, -inf }
 0x27d   :  { %1065 = vmax.xlane.f32.xlu1 %v2407_v36  ;;  %v2412_v37 = vsel %vm998_vm0, %v982_v35, -inf }
 0x27e   :  { %1063 = vmax.xlane.f32.xlu0 %v2412_v37 }
 0x27f   :  { %v1722_v38 = vpop.f32.mrb[18].mxu1 }
 0x280   :  { %v903_v39 = vadd.f32 %v1722_v38, %v2304_v25  ;;  %v897_v42 = vpop.f32.mrb[19].mxu1 }
 0x281   :  { %v898_v44 = vadd.f32 %v2304_v25, %v897_v42 }
 0x282   :  { %v985_v45 = vmax.f32 %v903_v39, 0.0 }
 0x283   :  { %v984_v46 = vmax.f32 %v898_v44, 0.0 }
 0x284   :  { %v2419_v47 = vsel %vm998_vm0, %v985_v45, -inf }
 0x285   :  { %1069 = vmax.xlane.f32.xlu1 %v2419_v47  ;;  %v2424_v48 = vsel %vm998_vm0, %v984_v46, -inf }
 0x286   :  { %1067 = vmax.xlane.f32.xlu0 %v2424_v48 }
 0x287   :  { %v1725_v51 = vpop.f32.mrb[20].mxu1 }
 0x288   :  { %v913_v52 = vadd.f32 %v1725_v51, %v2304_v25  ;;  %v907_v53 = vpop.f32.mrb[21].mxu1 }
 0x289   :  { %v908_v54 = vadd.f32 %v2304_v25, %v907_v53 }
 0x28a   :  { %v987_v56 = vmax.f32 %v913_v52, 0.0 }
 0x28b   :  { %v986_v57 = vmax.f32 %v908_v54, 0.0 }
 0x28c   :  { %v2431_v60 = vsel %vm998_vm0, %v987_v56, -inf }
 0x28d   :  { %2806 = vst [vmem:[#allocation2_spill] sm:$0xff] %v2431_v60  ;;  %1073 = vmax.xlane.f32.xlu1 %v2431_v60  ;;  %v2436_v61 = vsel %vm998_vm0, %v986_v57, -inf }
 0x28e   :  { %2807 = vst [vmem:[#allocation3_spill] sm:$0xff] %v2436_v61  ;;  %1071 = vmax.xlane.f32.xlu0 %v2436_v61 }
 0x28f   :  { %v1728_v62 = vpop.f32.mrb[22].mxu1 }
 0x290   :  { %v923_v63 = vadd.f32 %v1728_v62, %v2304_v25  ;;  %v917_v0 = vpop.f32.mrb[23].mxu1 }
 0x291   :  { %v918_v43 = vadd.f32 %v2304_v25, %v917_v0 }
 0x292   :  { %v989_v3 = vmax.f32 %v923_v63, 0.0 }
 0x293   :  { %v988_v4 = vmax.f32 %v918_v43, 0.0 }
 0x294   :  { %v2443_v5 = vsel %vm998_vm0, %v989_v3, -inf }
 0x295   :  { %2808 = vst [vmem:[#allocation4_spill] sm:$0xff] %v2443_v5  ;;  %1077 = vmax.xlane.f32.xlu1 %v2443_v5  ;;  %v2448_v6 = vsel %vm998_vm0, %v988_v4, -inf }
 0x296   :  { %2809 = vst [vmem:[#allocation5_spill] sm:$0xff] %v2448_v6  ;;  %1075 = vmax.xlane.f32.xlu0 %v2448_v6 }
 0x297   :  { %v1731_v7 = vpop.f32.mrb[24].mxu1 }
 0x298   :  { %v933_v8 = vadd.f32 %v1731_v7, %v2304_v25  ;;  %v927_v11 = vpop.f32.mrb[25].mxu1 }
 0x299   :  { %v928_v12 = vadd.f32 %v2304_v25, %v927_v11 }
 0x29a   :  { %v991_v13 = vmax.f32 %v933_v8, 0.0 }
 0x29b   :  { %v990_v14 = vmax.f32 %v928_v12, 0.0 }
 0x29c   :  { %v2455_v15 = vsel %vm998_vm0, %v991_v13, -inf }
 0x29d   :  { %2810 = vst [vmem:[#allocation6_spill] sm:$0xff] %v2455_v15  ;;  %1081 = vmax.xlane.f32.xlu1 %v2455_v15  ;;  %v2460_v16 = vsel %vm998_vm0, %v990_v14, -inf }
 0x29e   :  { %2811 = vst [vmem:[#allocation7_spill] sm:$0xff] %v2460_v16  ;;  %1079 = vmax.xlane.f32.xlu0 %v2460_v16 }
 0x29f   :  { %v1734_v19 = vpop.f32.mrb[26].mxu1 }
 0x2a0   :  { %v943_v20 = vadd.f32 %v1734_v19, %v2304_v25  ;;  %v937_v21 = vpop.f32.mrb[27].mxu1 }
 0x2a1   :  { %v938_v22 = vadd.f32 %v2304_v25, %v937_v21 }
 0x2a2   :  { %v993_v23 = vmax.f32 %v943_v20, 0.0 }
 0x2a3   :  { %v992_v24 = vmax.f32 %v938_v22, 0.0 }
 0x2a4   :  { %v2467_v28 = vsel %vm998_vm0, %v993_v23, -inf }
 0x2a5   :  { %2812 = vst [vmem:[#allocation8_spill] sm:$0xff] %v2467_v28  ;;  %1085 = vmax.xlane.f32.xlu1 %v2467_v28  ;;  %v2472_v30 = vsel %vm998_vm0, %v992_v24, -inf }
 0x2a6   :  { %2813 = vst [vmem:[#allocation9_spill] sm:$0xff] %v2472_v30  ;;  %1083 = vmax.xlane.f32.xlu0 %v2472_v30 }
 0x2a7   :  { %v1737_v31 = vpop.f32.mrb[28].mxu1 }
 0x2a8   :  { %v953_v32 = vadd.f32 %v1737_v31, %v2304_v25  ;;  %v947_v34 = vpop.f32.mrb[29].mxu1 }
 0x2a9   :  { %v948_v35 = vadd.f32 %v2304_v25, %v947_v34 }
 0x2aa   :  { %v995_v38 = vmax.f32 %v953_v32, 0.0 }
 0x2ab   :  { %v994_v39 = vmax.f32 %v948_v35, 0.0 }
 0x2ac   :  { %v2479_v42 = vsel %vm998_vm0, %v995_v38, -inf }
 0x2ad   :  { %2814 = vst [vmem:[#allocation10_spill] sm:$0xff] %v2479_v42  ;;  %1089 = vmax.xlane.f32.xlu1 %v2479_v42  ;;  %v2484_v44 = vsel %vm998_vm0, %v994_v39, -inf }
 0x2ae   :  { %2815 = vst [vmem:[#allocation11_spill] sm:$0xff] %v2484_v44  ;;  %1087 = vmax.xlane.f32.xlu0 %v2484_v44 }
 0x2af   :  { %v1740_v45 = vpop.f32.mrb[30].mxu1 }
 0x2b0   :  { %v963_v46 = vadd.f32 %v1740_v45, %v2304_v25  ;;  %v957_v51 = vpop.f32.mrb[31].mxu1 }
 0x2b1   :  { %v958_v52 = vadd.f32 %v2304_v25, %v957_v51 }
 0x2b2   :  { %v997_v53 = vmax.f32 %v963_v46, 0.0 }
 0x2b3   :  { %v996_v54 = vmax.f32 %v958_v52, 0.0 }
 0x2b4   :  { %v2491_v56 = vsel %vm998_vm0, %v997_v53, -inf }
 0x2b5   :  { %2816 = vst [vmem:[#allocation12_spill] sm:$0xff] %v2491_v56  ;;  %1093 = vmax.xlane.f32.xlu1 %v2491_v56  ;;  %v2496_v57 = vsel %vm998_vm0, %v996_v54, -inf }
 0x2b6   :  { %2817 = vst [vmem:[#allocation13_spill] sm:$0xff] %v2496_v57  ;;  %1091 = vmax.xlane.f32.xlu0 %v2496_v57 }
 0x2cb   :  { %v2499_v62 = vpop.xlane.xlu0 %1033 }
 0x2cc   :  { %v1096_v63 = vsub.f32 %v2311_v55, %v2499_v62  ;;  %v2503_v25 = vpop.xlane.xlu1 %1031 }
 0x2cd   :  { %v1095_v0 = vsub.f32 %v2316_v33, %v2503_v25 }
 0x2ce   :  { %v1129_v43 = vmul.f32 1.442695, %v1096_v63 }
 0x2cf   :  { %v1127_v3 = vmul.f32 1.442695, %v1095_v0 }
 0x2d0   :  { %1813 = vpow2.f32 %v1129_v43 }
 0x2d1   :  { %1815 = vpow2.f32 %v1127_v3 }
 0x2d2   :  { %v2507_v4 = vpop.xlane.xlu1 %1037 }
 0x2d3   :  { %v1098_v29 = vsub.f32 %v2323_v40, %v2507_v4  ;;  %v2511_v7 = vpop.xlane.xlu0 %1035 }
 0x2d4   :  { %v1097_v8 = vsub.f32 %v2328_v41, %v2511_v7 }
 0x2d5   :  { %v1133_v11 = vmul.f32 1.442695, %v1098_v29 }
 0x2d6   :  { %v1131_v12 = vmul.f32 1.442695, %v1097_v8 }
 0x2d7   :  { %1817 = vpow2.f32 %v1133_v11 }
 0x2d8   :  { %1819 = vpow2.f32 %v1131_v12 }
 0x2da   :  { %v1814_v13 = vpop.eup %1813  ;;  %v2515_v14 = vpop.xlane.xlu1 %1041 }
 0x2db   :  { %v1816_v19 = vpop.eup %1815  ;;  %v1100_v20 = vsub.f32 %v2335_v49, %v2515_v14  ;;  %1193 = vadd.xlane.f32.xlu1 %v1814_v13  ;;  %v2519_v21 = vpop.xlane.xlu0 %1039 }
 0x2dc   :  { %1191 = vadd.xlane.f32.xlu0 %v1816_v19  ;;  %v1099_v22 = vsub.f32 %v2340_v50, %v2519_v21 }
 0x2dd   :  { %v1137_v23 = vmul.f32 1.442695, %v1100_v20 }
 0x2de   :  { %v1135_v24 = vmul.f32 1.442695, %v1099_v22 }
 0x2df   :  { %1821 = vpow2.f32 %v1137_v23 }
 0x2e0   :  { %1823 = vpow2.f32 %v1135_v24 }
 0x2e1   :  { %v1818_v31 = vpop.eup %1817 }
 0x2e2   :  { %v1820_v32 = vpop.eup %1819  ;;  %v2523_v34 = vpop.xlane.xlu1 %1045  ;;  %1197 = vadd.xlane.f32.xlu1 %v1818_v31 }
 0x2e3   :  { %v1102_v35 = vsub.f32 %v2347_v58, %v2523_v34  ;;  %1195 = vadd.xlane.f32.xlu0 %v1820_v32  ;;  %v2527_v38 = vpop.xlane.xlu0 %1043 }
 0x2e4   :  { %v1101_v39 = vsub.f32 %v2352_v59, %v2527_v38 }
 0x2e5   :  { %v1141_v45 = vmul.f32 1.442695, %v1102_v35 }
 0x2e6   :  { %v1139_v46 = vmul.f32 1.442695, %v1101_v39 }
 0x2e7   :  { %1825 = vpow2.f32 %v1141_v45 }
 0x2e8   :  { %1827 = vpow2.f32 %v1139_v46 }
 0x2e9   :  { %v1822_v51 = vpop.eup %1821 }
 0x2ea   :  { %v1824_v52 = vpop.eup %1823  ;;  %v2531_v53 = vpop.xlane.xlu1 %1049  ;;  %1201 = vadd.xlane.f32.xlu1 %v1822_v51 }
 0x2eb   :  { %v1104_v54 = vsub.f32 %v2359_v1, %v2531_v53  ;;  %1199 = vadd.xlane.f32.xlu0 %v1824_v52  ;;  %v2535_v63 = vpop.xlane.xlu0 %1047 }
 0x2ec   :  { %v1103_v0 = vsub.f32 %v2364_v2, %v2535_v63 }
 0x2ed   :  { %v1145_v43 = vmul.f32 1.442695, %v1104_v54 }
 0x2ee   :  { %v1143_v3 = vmul.f32 1.442695, %v1103_v0 }
 0x2ef   :  { %1829 = vpow2.f32 %v1145_v43 }
 0x2f0   :  { %1831 = vpow2.f32 %v1143_v3 }
 0x2f1   :  { %v1826_v29 = vpop.eup %1825 }
 0x2f2   :  { %v1828_v8 = vpop.eup %1827  ;;  %v2539_v11 = vpop.xlane.xlu1 %1053  ;;  %1205 = vadd.xlane.f32.xlu1 %v1826_v29 }
 0x2f3   :  { %v1106_v12 = vsub.f32 %v2371_v9, %v2539_v11  ;;  %1203 = vadd.xlane.f32.xlu0 %v1828_v8  ;;  %v2543_v13 = vpop.xlane.xlu0 %1051 }
 0x2f4   :  { %v1105_v19 = vsub.f32 %v2376_v10, %v2543_v13 }
 0x2f5   :  { %v1149_v20 = vmul.f32 1.442695, %v1106_v12 }
 0x2f6   :  { %v1147_v22 = vmul.f32 1.442695, %v1105_v19 }
 0x2f7   :  { %1833 = vpow2.f32 %v1149_v20 }
 0x2f8   :  { %1835 = vpow2.f32 %v1147_v22 }
 0x2f9   :  { %v1830_v23 = vpop.eup %1829 }
 0x2fa   :  { %v1832_v24 = vpop.eup %1831  ;;  %v2547_v31 = vpop.xlane.xlu1 %1057  ;;  %1209 = vadd.xlane.f32.xlu1 %v1830_v23 }
 0x2fb   :  { %v1108_v32 = vsub.f32 %v2383_v17, %v2547_v31  ;;  %1207 = vadd.xlane.f32.xlu0 %v1832_v24  ;;  %v2551_v35 = vpop.xlane.xlu0 %1055 }
 0x2fc   :  { %v1107_v39 = vsub.f32 %v2388_v18, %v2551_v35 }
 0x2fd   :  { %v1153_v45 = vmul.f32 1.442695, %v1108_v32 }
 0x2fe   :  { %v1151_v46 = vmul.f32 1.442695, %v1107_v39 }
 0x2ff   :  { %1837 = vpow2.f32 %v1153_v45 }
 0x300   :  { %1839 = vpow2.f32 %v1151_v46 }
 0x301   :  { %v1834_v51 = vpop.eup %1833 }
 0x302   :  { %v1836_v52 = vpop.eup %1835  ;;  %v2555_v54 = vpop.xlane.xlu1 %1061  ;;  %1213 = vadd.xlane.f32.xlu1 %v1834_v51 }
 0x303   :  { %v1110_v0 = vsub.f32 %v2395_v26, %v2555_v54  ;;  %1211 = vadd.xlane.f32.xlu0 %v1836_v52  ;;  %v2559_v43 = vpop.xlane.xlu0 %1059 }
 0x304   :  { %v1109_v3 = vsub.f32 %v2400_v27, %v2559_v43 }
 0x305   :  { %v1157_v29 = vmul.f32 1.442695, %v1110_v0 }
 0x306   :  { %v1155_v8 = vmul.f32 1.442695, %v1109_v3 }
 0x307   :  { %1841 = vpow2.f32 %v1157_v29 }
 0x308   :  { %1843 = vpow2.f32 %v1155_v8 }
 0x309   :  { %v1838_v12 = vpop.eup %1837 }
 0x30a   :  { %v1840_v19 = vpop.eup %1839  ;;  %v2563_v20 = vpop.xlane.xlu1 %1065  ;;  %1217 = vadd.xlane.f32.xlu1 %v1838_v12 }
 0x30b   :  { %v1112_v22 = vsub.f32 %v2407_v36, %v2563_v20  ;;  %1215 = vadd.xlane.f32.xlu0 %v1840_v19  ;;  %v2567_v23 = vpop.xlane.xlu0 %1063 }
 0x30c   :  { %v1111_v24 = vsub.f32 %v2412_v37, %v2567_v23 }
 0x30d   :  { %v1161_v32 = vmul.f32 1.442695, %v1112_v22 }
 0x30e   :  { %v1159_v39 = vmul.f32 1.442695, %v1111_v24 }
 0x30f   :  { %1845 = vpow2.f32 %v1161_v32 }
 0x310   :  { %1847 = vpow2.f32 %v1159_v39 }
 0x311   :  { %v1842_v45 = vpop.eup %1841 }
 0x312   :  { %v1844_v46 = vpop.eup %1843  ;;  %v2571_v51 = vpop.xlane.xlu1 %1069  ;;  %1221 = vadd.xlane.f32.xlu1 %v1842_v45 }
 0x313   :  { %v1114_v52 = vsub.f32 %v2419_v47, %v2571_v51  ;;  %1219 = vadd.xlane.f32.xlu0 %v1844_v46  ;;  %v2575_v0 = vpop.xlane.xlu0 %1067 }
 0x314   :  { %v1113_v3 = vsub.f32 %v2424_v48, %v2575_v0 }
 0x315   :  { %v1165_v29 = vmul.f32 1.442695, %v1114_v52 }
 0x316   :  { %v1163_v8 = vmul.f32 1.442695, %v1113_v3 }
 0x317   :  { %1849 = vpow2.f32 %v1165_v29 }
 0x318   :  { %1851 = vpow2.f32 %v1163_v8 }
 0x319   :  { %v1846_v12 = vpop.eup %1845 }
 0x31a   :  { %v1848_v19 = vpop.eup %1847  ;;  %v2579_v22 = vpop.xlane.xlu1 %1073  ;;  %1225 = vadd.xlane.f32.xlu1 %v1846_v12 }
 0x31b   :  { %v1116_v24 = vsub.f32 %v2431_v60, %v2579_v22  ;;  %1223 = vadd.xlane.f32.xlu0 %v1848_v19  ;;  %v2583_v32 = vpop.xlane.xlu0 %1071 }
 0x31c   :  { %v1115_v39 = vsub.f32 %v2436_v61, %v2583_v32 }
 0x31d   :  { %v1169_v45 = vmul.f32 1.442695, %v1116_v24 }
 0x31e   :  { %v1167_v46 = vmul.f32 1.442695, %v1115_v39 }
 0x31f   :  { %1853 = vpow2.f32 %v1169_v45 }
 0x320   :  { %1855 = vpow2.f32 %v1167_v46 }
 0x321   :  { %v1850_v52 = vpop.eup %1849 }
 0x322   :  { %v1852_v3 = vpop.eup %1851  ;;  %v2587_v29 = vpop.xlane.xlu1 %1077  ;;  %1229 = vadd.xlane.f32.xlu1 %v1850_v52 }
 0x323   :  { %v1118_v8 = vsub.f32 %v2443_v5, %v2587_v29  ;;  %1227 = vadd.xlane.f32.xlu0 %v1852_v3  ;;  %v2591_v12 = vpop.xlane.xlu0 %1075 }
 0x324   :  { %v1117_v19 = vsub.f32 %v2448_v6, %v2591_v12 }
 0x325   :  { %v1173_v60 = vmul.f32 1.442695, %v1118_v8 }
 0x326   :  { %v1171_v61 = vmul.f32 1.442695, %v1117_v19 }
 0x327   :  { %1857 = vpow2.f32 %v1173_v60 }
 0x328   :  { %1859 = vpow2.f32 %v1171_v61 }
 0x329   :  { %v1854_v24 = vpop.eup %1853 }
 0x32a   :  { %v1856_v39 = vpop.eup %1855  ;;  %v2595_v45 = vpop.xlane.xlu1 %1081  ;;  %1233 = vadd.xlane.f32.xlu1 %v1854_v24 }
 0x32b   :  { %v1120_v46 = vsub.f32 %v2455_v15, %v2595_v45  ;;  %1231 = vadd.xlane.f32.xlu0 %v1856_v39  ;;  %v2599_v52 = vpop.xlane.xlu0 %1079 }
 0x32c   :  { %v1119_v3 = vsub.f32 %v2460_v16, %v2599_v52 }
 0x32d   :  { %v1177_v5 = vmul.f32 1.442695, %v1120_v46 }
 0x32e   :  { %v1175_v6 = vmul.f32 1.442695, %v1119_v3 }
 0x32f   :  { %1861 = vpow2.f32 %v1177_v5 }
 0x330   :  { %1863 = vpow2.f32 %v1175_v6 }
 0x331   :  { %v1858_v60 = vpop.eup %1857 }
 0x332   :  { %v1860_v61 = vpop.eup %1859  ;;  %v2603_v8 = vpop.xlane.xlu1 %1085  ;;  %1237 = vadd.xlane.f32.xlu1 %v1858_v60 }
 0x333   :  { %v1122_v19 = vsub.f32 %v2467_v28, %v2603_v8  ;;  %1235 = vadd.xlane.f32.xlu0 %v1860_v61  ;;  %v2607_v24 = vpop.xlane.xlu0 %1083 }
 0x334   :  { %v1121_v39 = vsub.f32 %v2472_v30, %v2607_v24 }
 0x335   :  { %v1181_v15 = vmul.f32 1.442695, %v1122_v19 }
 0x336   :  { %v1179_v16 = vmul.f32 1.442695, %v1121_v39 }
 0x337   :  { %1865 = vpow2.f32 %v1181_v15 }
 0x338   :  { %1867 = vpow2.f32 %v1179_v16 }
 0x339   :  { %v1862_v5 = vpop.eup %1861 }
 0x33a   :  { %v1864_v6 = vpop.eup %1863  ;;  %v2611_v46 = vpop.xlane.xlu1 %1089  ;;  %1241 = vadd.xlane.f32.xlu1 %v1862_v5 }
 0x33b   :  { %v1124_v3 = vsub.f32 %v2479_v42, %v2611_v46  ;;  %1239 = vadd.xlane.f32.xlu0 %v1864_v6  ;;  %v2615_v60 = vpop.xlane.xlu0 %1087 }
 0x33c   :  { %v1123_v61 = vsub.f32 %v2484_v44, %v2615_v60 }
 0x33d   :  { %v1185_v28 = vmul.f32 1.442695, %v1124_v3 }
 0x33e   :  { %v1183_v30 = vmul.f32 1.442695, %v1123_v61 }
 0x33f   :  { %1869 = vpow2.f32 %v1185_v28 }
 0x340   :  { %1871 = vpow2.f32 %v1183_v30 }
 0x341   :  { %v1866_v15 = vpop.eup %1865 }
 0x342   :  { %v1868_v16 = vpop.eup %1867  ;;  %v2619_v19 = vpop.xlane.xlu1 %1093  ;;  %1245 = vadd.xlane.f32.xlu1 %v1866_v15 }
 0x343   :  { %2818 = vst [vmem:[#allocation14_spill] sm:$0xff] %v2619_v19  ;;  %v1126_v39 = vsub.f32 %v2491_v56, %v2619_v19  ;;  %1243 = vadd.xlane.f32.xlu0 %v1868_v16  ;;  %v2623_v5 = vpop.xlane.xlu0 %1091 }
 0x344   :  { %v1125_v6 = vsub.f32 %v2496_v57, %v2623_v5 }
 0x345   :  { %v1189_v42 = vmul.f32 1.442695, %v1126_v39 }
 0x346   :  { %v1187_v44 = vmul.f32 1.442695, %v1125_v6 }
 0x347   :  { %1873 = vpow2.f32 %v1189_v42 }
 0x348   :  { %1875 = vpow2.f32 %v1187_v44 }
 0x349   :  { %v1870_v28 = vpop.eup %1869 }
 0x34a   :  { %v1872_v30 = vpop.eup %1871  ;;  %1249 = vadd.xlane.f32.xlu1 %v1870_v28 }
 0x34b   :  { %1247 = vadd.xlane.f32.xlu0 %v1872_v30 }
 0x351   :  { %v1874_v3 = vpop.eup %1873 }
 0x352   :  { %v1876_v61 = vpop.eup %1875  ;;  %1253 = vadd.xlane.f32.xlu1 %v1874_v3 }
 0x353   :  { %1251 = vadd.xlane.f32.xlu0 %v1876_v61 }
 0x368   :  { %v1194_v15 = vpop.xlane.xlu1 %1193 }
 0x369   :  { %1877 = vlog2.f32 %v1194_v15  ;;  %v1192_v16 = vpop.xlane.xlu0 %1191 }
 0x36a   :  { %1879 = vlog2.f32 %v1192_v16 }
 0x36f   :  { %v1198_v56 = vpop.xlane.xlu1 %1197 }
 0x370   :  { %1881 = vlog2.f32 %v1198_v56  ;;  %v1196_v19 = vpop.xlane.xlu0 %1195 }
 0x371   :  { %1883 = vlog2.f32 %v1196_v19 }
 0x373   :  { %v1878_v39 = vpop.eup %1877 }
 0x374   :  { %v1880_v6 = vpop.eup %1879  ;;  %v1258_v42 = vmul.f32 0.6931472, %v1878_v39 }
 0x375   :  { %v1256_v44 = vmul.f32 0.6931472, %v1880_v6 }
 0x376   :  { %v1320_v57 = vadd.f32 %v1258_v42, %v2499_v62 }
 0x377   :  { %v1319_v28 = vadd.f32 %v1256_v44, %v2503_v25  ;;  %v1202_v30 = vpop.xlane.xlu1 %1201 }
 0x378   :  { %v1352_v3 = vsub.f32 %v2311_v55, %v1320_v57  ;;  %1885 = vlog2.f32 %v1202_v30  ;;  %v1200_v61 = vpop.xlane.xlu0 %1199 }
 0x379   :  { %v1351_v15 = vsub.f32 %v2316_v33, %v1319_v28  ;;  %1887 = vlog2.f32 %v1200_v61 }
 0x37a   :  { %v1882_v16 = vpop.eup %1881  ;;  %1384 = vst [vmem:[%s2792_s5 + $0x8] sm:$0xff] %v1352_v3 }
 0x37b   :  { %v1884_v56 = vpop.eup %1883  ;;  %1383 = vst [vmem:[%s2792_s5] sm:$0xff] %v1351_v15  ;;  %v1262_v62 = vmul.f32 0.6931472, %v1882_v16 }
 0x37c   :  { %v1260_v25 = vmul.f32 0.6931472, %v1884_v56 }
 0x37d   :  { %v1322_v19 = vadd.f32 %v1262_v62, %v2507_v4 }
 0x37e   :  { %v1321_v55 = vadd.f32 %v1260_v25, %v2511_v7 }
 0x37f   :  { %v1354_v57 = vsub.f32 %v2323_v40, %v1322_v19  ;;  %v1206_v33 = vpop.xlane.xlu1 %1205 }
 0x380   :  { %v1353_v39 = vsub.f32 %v2328_v41, %v1321_v55  ;;  %1889 = vlog2.f32 %v1206_v33  ;;  %v1204_v6 = vpop.xlane.xlu0 %1203 }
 0x381   :  { %1386 = vst [vmem:[%s2792_s5 + $0x18] sm:$0xff] %v1354_v57  ;;  %1891 = vlog2.f32 %v1204_v6 }
 0x382   :  { %v1886_v42 = vpop.eup %1885  ;;  %1385 = vst [vmem:[%s2792_s5 + $0x10] sm:$0xff] %v1353_v39 }
 0x383   :  { %v1888_v4 = vpop.eup %1887  ;;  %v1266_v44 = vmul.f32 0.6931472, %v1886_v42 }
 0x384   :  { %v1264_v7 = vmul.f32 0.6931472, %v1888_v4 }
 0x385   :  { %v1324_v40 = vadd.f32 %v1266_v44, %v2515_v14 }
 0x386   :  { %v1323_v28 = vadd.f32 %v1264_v7, %v2519_v21 }
 0x387   :  { %v1356_v41 = vsub.f32 %v2335_v49, %v1324_v40  ;;  %v1210_v30 = vpop.xlane.xlu1 %1209 }
 0x388   :  { %v1355_v3 = vsub.f32 %v2340_v50, %v1323_v28  ;;  %1893 = vlog2.f32 %v1210_v30  ;;  %v1208_v61 = vpop.xlane.xlu0 %1207 }
 0x389   :  { %1388 = vst [vmem:[%s2792_s5 + $0x28] sm:$0xff] %v1356_v41  ;;  %1895 = vlog2.f32 %v1208_v61 }
 0x38a   :  { %v1890_v15 = vpop.eup %1889  ;;  %1387 = vst [vmem:[%s2792_s5 + $0x20] sm:$0xff] %v1355_v3 }
 0x38b   :  { %v1892_v14 = vpop.eup %1891  ;;  %v1270_v16 = vmul.f32 0.6931472, %v1890_v15 }
 0x38c   :  { %v1268_v21 = vmul.f32 0.6931472, %v1892_v14 }
 0x38d   :  { %v1326_v49 = vadd.f32 %v1270_v16, %v2523_v34 }
 0x38e   :  { %v1325_v56 = vadd.f32 %v1268_v21, %v2527_v38 }
 0x38f   :  { %v1358_v50 = vsub.f32 %v2347_v58, %v1326_v49  ;;  %v1214_v62 = vpop.xlane.xlu1 %1213 }
 0x390   :  { %v1357_v25 = vsub.f32 %v2352_v59, %v1325_v56  ;;  %1897 = vlog2.f32 %v1214_v62  ;;  %v1212_v19 = vpop.xlane.xlu0 %1211 }
 0x391   :  { %1390 = vst [vmem:[%s2792_s5 + $0x38] sm:$0xff] %v1358_v50  ;;  %1899 = vlog2.f32 %v1212_v19 }
 0x392   :  { %v1894_v55 = vpop.eup %1893  ;;  %1389 = vst [vmem:[%s2792_s5 + $0x30] sm:$0xff] %v1357_v25 }
 0x393   :  { %v1896_v34 = vpop.eup %1895  ;;  %v1274_v57 = vmul.f32 0.6931472, %v1894_v55 }
 0x394   :  { %v1272_v38 = vmul.f32 0.6931472, %v1896_v34 }
 0x395   :  { %v1328_v58 = vadd.f32 %v1274_v57, %v2531_v53 }
 0x396   :  { %v1327_v33 = vadd.f32 %v1272_v38, %v2535_v63 }
 0x397   :  { %v1360_v59 = vsub.f32 %v2359_v1, %v1328_v58  ;;  %v1218_v39 = vpop.xlane.xlu1 %1217 }
 0x398   :  { %v1359_v6 = vsub.f32 %v2364_v2, %v1327_v33  ;;  %1901 = vlog2.f32 %v1218_v39  ;;  %v1216_v42 = vpop.xlane.xlu0 %1215 }
 0x399   :  { %1392 = vst [vmem:[%s2792_s5 + $0x48] sm:$0xff] %v1360_v59  ;;  %1903 = vlog2.f32 %v1216_v42 }
 0x39a   :  { %v1898_v4 = vpop.eup %1897  ;;  %1391 = vst [vmem:[%s2792_s5 + $0x40] sm:$0xff] %v1359_v6 }
 0x39b   :  { %v1900_v53 = vpop.eup %1899  ;;  %v1278_v44 = vmul.f32 0.6931472, %v1898_v4 }
 0x39c   :  { %v1276_v63 = vmul.f32 0.6931472, %v1900_v53 }
 0x39d   :  { %v1330_v1 = vadd.f32 %v1278_v44, %v2539_v11 }
 0x39e   :  { %v1329_v7 = vadd.f32 %v1276_v63, %v2543_v13 }
 0x39f   :  { %v1362_v2 = vsub.f32 %v2371_v9, %v1330_v1  ;;  %v1222_v40 = vpop.xlane.xlu1 %1221 }
 0x3a0   :  { %v1361_v28 = vsub.f32 %v2376_v10, %v1329_v7  ;;  %1905 = vlog2.f32 %v1222_v40  ;;  %v1220_v41 = vpop.xlane.xlu0 %1219 }
 0x3a1   :  { %1394 = vst [vmem:[%s2792_s5 + $0x58] sm:$0xff] %v1362_v2  ;;  %1907 = vlog2.f32 %v1220_v41  ;;  %v2820_v2 = vld [vmem:[#allocation3_spill] sm:$0xff] }
 0x3a2   :  { %v1902_v30 = vpop.eup %1901  ;;  %1393 = vst [vmem:[%s2792_s5 + $0x50] sm:$0xff] %v1361_v28 }
 0x3a3   :  { %v1904_v11 = vpop.eup %1903  ;;  %v1282_v3 = vmul.f32 0.6931472, %v1902_v30 }
 0x3a4   :  { %v1280_v13 = vmul.f32 0.6931472, %v1904_v11 }
 0x3a5   :  { %v1332_v9 = vadd.f32 %v1282_v3, %v2547_v31 }
 0x3a6   :  { %v1331_v61 = vadd.f32 %v1280_v13, %v2551_v35  ;;  %v2821_v13 = vld [vmem:[#allocation4_spill] sm:$0xff] }
 0x3a7   :  { %v1364_v10 = vsub.f32 %v2383_v17, %v1332_v9  ;;  %v1226_v15 = vpop.xlane.xlu1 %1225 }
 0x3a8   :  { %v1363_v14 = vsub.f32 %v2388_v18, %v1331_v61  ;;  %1909 = vlog2.f32 %v1226_v15  ;;  %v1224_v16 = vpop.xlane.xlu0 %1223 }
 0x3a9   :  { %1396 = vst [vmem:[%s2792_s5 + $0x68] sm:$0xff] %v1364_v10  ;;  %1911 = vlog2.f32 %v1224_v16  ;;  %v2822_v10 = vld [vmem:[#allocation5_spill] sm:$0xff] }
 0x3aa   :  { %v1906_v21 = vpop.eup %1905  ;;  %1395 = vst [vmem:[%s2792_s5 + $0x60] sm:$0xff] %v1363_v14 }
 0x3ab   :  { %v1908_v31 = vpop.eup %1907  ;;  %v1286_v49 = vmul.f32 0.6931472, %v1906_v21 }
 0x3ac   :  { %v1284_v35 = vmul.f32 0.6931472, %v1908_v31 }
 0x3ad   :  { %v1334_v17 = vadd.f32 %v1286_v49, %v2555_v54 }
 0x3ae   :  { %v1333_v56 = vadd.f32 %v1284_v35, %v2559_v43  ;;  %v2823_v35 = vld [vmem:[#allocation6_spill] sm:$0xff] }
 0x3af   :  { %v1366_v18 = vsub.f32 %v2395_v26, %v1334_v17  ;;  %v1230_v50 = vpop.xlane.xlu1 %1229 }
 0x3b0   :  { %v1365_v62 = vsub.f32 %v2400_v27, %v1333_v56  ;;  %1913 = vlog2.f32 %v1230_v50  ;;  %v1228_v25 = vpop.xlane.xlu0 %1227 }
 0x3b1   :  { %1398 = vst [vmem:[%s2792_s5 + $0x78] sm:$0xff] %v1366_v18  ;;  %1915 = vlog2.f32 %v1228_v25  ;;  %v2824_v18 = vld [vmem:[#allocation7_spill] sm:$0xff] }
 0x3b2   :  { %v1910_v19 = vpop.eup %1909  ;;  %1397 = vst [vmem:[%s2792_s5 + $0x70] sm:$0xff] %v1365_v62 }
 0x3b3   :  { %v1912_v54 = vpop.eup %1911  ;;  %v1290_v55 = vmul.f32 0.6931472, %v1910_v19 }
 0x3b4   :  { %v1288_v43 = vmul.f32 0.6931472, %v1912_v54 }
 0x3b5   :  { %v1336_v26 = vadd.f32 %v1290_v55, %v2563_v20 }
 0x3b6   :  { %v1335_v34 = vadd.f32 %v1288_v43, %v2567_v23  ;;  %v2825_v43 = vld [vmem:[#allocation8_spill] sm:$0xff] }
 0x3b7   :  { %v1368_v27 = vsub.f32 %v2407_v36, %v1336_v26  ;;  %v1234_v57 = vpop.xlane.xlu1 %1233 }
 0x3b8   :  { %v1367_v38 = vsub.f32 %v2412_v37, %v1335_v34  ;;  %1917 = vlog2.f32 %v1234_v57  ;;  %v1232_v58 = vpop.xlane.xlu0 %1231 }
 0x3b9   :  { %1400 = vst [vmem:[%s2792_s5 + $0x88] sm:$0xff] %v1368_v27  ;;  %1919 = vlog2.f32 %v1232_v58  ;;  %v2826_v27 = vld [vmem:[#allocation9_spill] sm:$0xff] }
 0x3ba   :  { %v1914_v33 = vpop.eup %1913  ;;  %1399 = vst [vmem:[%s2792_s5 + $0x80] sm:$0xff] %v1367_v38 }
 0x3bb   :  { %v1916_v20 = vpop.eup %1915  ;;  %v1294_v59 = vmul.f32 0.6931472, %v1914_v33 }
 0x3bc   :  { %v1292_v23 = vmul.f32 0.6931472, %v1916_v20 }
 0x3bd   :  { %v1338_v36 = vadd.f32 %v1294_v59, %v2571_v51 }
 0x3be   :  { %v1337_v39 = vadd.f32 %v1292_v23, %v2575_v0  ;;  %v2827_v23 = vld [vmem:[#allocation10_spill] sm:$0xff] }
 0x3bf   :  { %v1370_v37 = vsub.f32 %v2419_v47, %v1338_v36  ;;  %v1238_v6 = vpop.xlane.xlu1 %1237 }
 0x3c0   :  { %v1369_v42 = vsub.f32 %v2424_v48, %v1337_v39  ;;  %1921 = vlog2.f32 %v1238_v6  ;;  %v1236_v4 = vpop.xlane.xlu0 %1235  ;;  %v2819_v48 = vld [vmem:[#allocation2_spill] sm:$0xff]  ;;  %v2828_v39 = vld [vmem:[#allocation11_spill] sm:$0xff] }
 0x3c1   :  { %1402 = vst [vmem:[%s2792_s5 + $0x98] sm:$0xff] %v1370_v37  ;;  %1923 = vlog2.f32 %v1236_v4 }
 0x3c2   :  { %v1918_v53 = vpop.eup %1917  ;;  %1401 = vst [vmem:[%s2792_s5 + $0x90] sm:$0xff] %v1369_v42 }
 0x3c3   :  { %v1920_v51 = vpop.eup %1919  ;;  %v1298_v44 = vmul.f32 0.6931472, %v1918_v53 }
 0x3c4   :  { %v1296_v0 = vmul.f32 0.6931472, %v1920_v51  ;;  %v2829_v51 = vld [vmem:[#allocation14_spill] sm:$0xff] }
 0x3c5   :  { %v1340_v47 = vadd.f32 %v1298_v44, %v2579_v22  ;;  %v2830_v44 = vld [vmem:[#allocation12_spill] sm:$0xff] }
 0x3c6   :  { %v1339_v63 = vadd.f32 %v1296_v0, %v2583_v32 }
 0x3c7   :  { %v1372_v1 = vsub.f32 %v2819_v48, %v1340_v47  ;;  %v1242_v7 = vpop.xlane.xlu1 %1241  ;;  %v2831_v47 = vld [vmem:[#allocation13_spill] sm:$0xff] }
 0x3c8   :  { %v1371_v40 = vsub.f32 %v2820_v2, %v1339_v63  ;;  %1925 = vlog2.f32 %v1242_v7  ;;  %v1240_v28 = vpop.xlane.xlu0 %1239 }
 0x3c9   :  { %1404 = vst [vmem:[%s2792_s5 + $0xa8] sm:$0xff] %v1372_v1  ;;  %1927 = vlog2.f32 %v1240_v28 }
 0x3ca   :  { %v1922_v41 = vpop.eup %1921  ;;  %1403 = vst [vmem:[%s2792_s5 + $0xa0] sm:$0xff] %v1371_v40 }
 0x3cb   :  { %v1924_v22 = vpop.eup %1923  ;;  %v1302_v30 = vmul.f32 0.6931472, %v1922_v41 }
 0x3cc   :  { %v1300_v32 = vmul.f32 0.6931472, %v1924_v22 }
 0x3cd   :  { %v1342_v11 = vadd.f32 %v1302_v30, %v2587_v29 }
 0x3ce   :  { %v1341_v3 = vadd.f32 %v1300_v32, %v2591_v12 }
 0x3cf   :  { %v1374_v9 = vsub.f32 %v2821_v13, %v1342_v11  ;;  %v1246_v61 = vpop.xlane.xlu1 %1245 }
 0x3d0   :  { %v1373_v15 = vsub.f32 %v2822_v10, %v1341_v3  ;;  %1929 = vlog2.f32 %v1246_v61  ;;  %v1244_v14 = vpop.xlane.xlu0 %1243 }
 0x3d1   :  { %1406 = vst [vmem:[%s2792_s5 + $0xb8] sm:$0xff] %v1374_v9  ;;  %1931 = vlog2.f32 %v1244_v14 }
 0x3d2   :  { %v1926_v16 = vpop.eup %1925  ;;  %1405 = vst [vmem:[%s2792_s5 + $0xb0] sm:$0xff] %v1373_v15 }
 0x3d3   :  { %v1928_v29 = vpop.eup %1927  ;;  %v1306_v21 = vmul.f32 0.6931472, %v1926_v16 }
 0x3d4   :  { %v1304_v12 = vmul.f32 0.6931472, %v1928_v29 }
 0x3d5   :  { %v1344_v31 = vadd.f32 %v1306_v21, %v2595_v45 }
 0x3d6   :  { %v1343_v49 = vadd.f32 %v1304_v12, %v2599_v52 }
 0x3d7   :  { %v1376_v17 = vsub.f32 %v2823_v35, %v1344_v31  ;;  %v1250_v56 = vpop.xlane.xlu1 %1249 }
 0x3d8   :  { %v1375_v50 = vsub.f32 %v2824_v18, %v1343_v49  ;;  %1933 = vlog2.f32 %v1250_v56  ;;  %v1248_v62 = vpop.xlane.xlu0 %1247 }
 0x3d9   :  { %1408 = vst [vmem:[%s2792_s5 + $0xc8] sm:$0xff] %v1376_v17  ;;  %1935 = vlog2.f32 %v1248_v62 }
 0x3da   :  { %v1930_v25 = vpop.eup %1929  ;;  %1407 = vst [vmem:[%s2792_s5 + $0xc0] sm:$0xff] %v1375_v50 }
 0x3db   :  { %v1932_v45 = vpop.eup %1931  ;;  %v1310_v19 = vmul.f32 0.6931472, %v1930_v25 }
 0x3dc   :  { %v1308_v52 = vmul.f32 0.6931472, %v1932_v45 }
 0x3dd   :  { %v1346_v54 = vadd.f32 %v1310_v19, %v2603_v8 }
 0x3de   :  { %v1345_v55 = vadd.f32 %v1308_v52, %v2607_v24 }
 0x3df   :  { %v1378_v26 = vsub.f32 %v2825_v43, %v1346_v54  ;;  %v1254_v34 = vpop.xlane.xlu1 %1253 }
 0x3e0   :  { %v1377_v57 = vsub.f32 %v2826_v27, %v1345_v55  ;;  %1937 = vlog2.f32 %v1254_v34  ;;  %v1252_v38 = vpop.xlane.xlu0 %1251 }
 0x3e1   :  { %1410 = vst [vmem:[%s2792_s5 + $0xd8] sm:$0xff] %v1378_v26  ;;  %1939 = vlog2.f32 %v1252_v38 }
 0x3e2   :  { %v1934_v58 = vpop.eup %1933  ;;  %1409 = vst [vmem:[%s2792_s5 + $0xd0] sm:$0xff] %v1377_v57 }
 0x3e3   :  { %v1936_v8 = vpop.eup %1935  ;;  %v1314_v33 = vmul.f32 0.6931472, %v1934_v58 }
 0x3e4   :  { %v1312_v24 = vmul.f32 0.6931472, %v1936_v8 }
 0x3e5   :  { %v1348_v20 = vadd.f32 %v1314_v33, %v2611_v46 }
 0x3e6   :  { %v1347_v59 = vadd.f32 %v1312_v24, %v2615_v60 }
 0x3e7   :  { %v1380_v36 = vsub.f32 %v2827_v23, %v1348_v20 }
 0x3e8   :  { %v1379_v37 = vsub.f32 %v2828_v39, %v1347_v59 }
 0x3e9   :  { %1412 = vst [vmem:[%s2792_s5 + $0xe8] sm:$0xff] %v1380_v36 }
 0x3ea   :  { %v1938_v6 = vpop.eup %1937  ;;  %1411 = vst [vmem:[%s2792_s5 + $0xe0] sm:$0xff] %v1379_v37 }
 0x3eb   :  { %v1940_v42 = vpop.eup %1939  ;;  %v1318_v4 = vmul.f32 0.6931472, %v1938_v6 }
 0x3ec   :  { %v1316_v53 = vmul.f32 0.6931472, %v1940_v42 }
 0x3ed   :  { %v1350_v46 = vadd.f32 %v1318_v4, %v2829_v51 }
 0x3ee   :  { %v1349_v60 = vadd.f32 %v1316_v53, %v2623_v5 }
 0x3ef   :  { %v1382_v0 = vsub.f32 %v2830_v44, %v1350_v46 }
 0x3f0   :  { %v1381_v63 = vsub.f32 %v2831_v47, %v1349_v60 }
 0x3f1   :  { %1414 = vst [vmem:[%s2792_s5 + $0xf8] sm:$0xff] %v1382_v0 }
 0x3f2   :  { %1413 = vst [vmem:[%s2792_s5 + $0xf0] sm:$0xff] %v1381_v63 }

</bundles_post_ra>
